<compile_context>
chip_gen: v5e
topology: v5e:2x2
jax: 0.10.0
libtpu: 0.0.40
codegen_flags: <defaults>
</compile_context>

<pallas_src>
import jax
import jax.numpy as jnp
from jax import lax
from jax.experimental import pallas as pl
from jax.experimental.pallas import tpu as pltpu

# Small hyperparameters consistent with the module's forward semantics.
VOCAB_SIZE = 500
EMBEDDING_DIM = 64
HIDDEN_DIM = 32
N_LAYERS = 2
OUTPUT_SIZE = 1


def _lstm_fc_kernel(tok_ref, gtbl_ref, h0_ref, c0_ref,
                    w_hh0_ref, w_l1_ref, b1_ref,
                    fc_w_ref, fc_b_ref,
                    sig_ref, state_ref):
    # tok_ref:  (T*Bp, 1) int32, time-major row index t*Bp + b
    # gtbl_ref: (VOCAB_PAD, 4H) f32 = embedding @ W_ih0 + b0 (g cols pre-scaled x2)
    # h0/c0:    (2, Bp, H)
    # w_hh0:    (H, 4H)  (g cols pre-scaled x2)
    # w_l1:     (2H, 4H) = stacked [W_ih1 ; W_hh1] (g cols pre-scaled x2)
    # b1:       (1, 4H)  (g lanes pre-scaled x2)
    # fc_w: (H, 1), fc_b: (1, 1)
    # outputs: sig_ref (Bp, 1); state_ref (Bp, 4H) packed [h_l0 | h_l1 | c_l0 | c_l1]
    TB = tok_ref.shape[0]
    V = gtbl_ref.shape[0]
    Bp = h0_ref.shape[1]
    H = HIDDEN_DIM
    T = TB // Bp

    # ---- fused embedding gather + layer-0 input projection: one-hot MXU matmul ----
    tok = tok_ref[...]                                             # (T*Bp, 1) int32
    vocab_iota = lax.broadcasted_iota(jnp.int32, (TB, V), 1)
    onehot = (vocab_iota == tok).astype(jnp.float32)               # (T*Bp, VOCAB_PAD)
    gates0_all = jnp.dot(onehot, gtbl_ref[...],
                         preferred_element_type=jnp.float32)       # (T*Bp, 4H)

    w_hh0 = w_hh0_ref[...]
    w_l1 = w_l1_ref[...]
    b1 = b1_ref[...]

    # Lane mask selecting the g-gate slice (PyTorch gate order [i, f, g, o]).
    lane = lax.broadcasted_iota(jnp.int32, (Bp, 4 * H), 1)
    g_mask = (lane >= 2 * H) & (lane < 3 * H)

    def activate(gates, c):
        # g lanes arrive pre-scaled by 2, so one full-vreg sigmoid covers all gates:
        #   tanh(z) = 2 * sigmoid(2z) - 1   (the fixup rides free VALU slots).
        s = jax.nn.sigmoid(gates)
        act = jnp.where(g_mask, 2.0 * s - 1.0, s)
        i = act[:, 0 * H:1 * H]
        f = act[:, 1 * H:2 * H]
        g = act[:, 2 * H:3 * H]
        o = act[:, 3 * H:4 * H]
        c_new = f * c + i * g
        h_new = o * jnp.tanh(c_new)
        return h_new, c_new

    # ---- wavefront-interleaved 2-layer recurrence (fully unrolled, T small) ----
    h1 = h0_ref[0]
    c1 = c0_ref[0]
    h2 = h0_ref[1]
    c2 = c0_ref[1]
    for t in range(T):
        # layer 1 (bottom), cell t: pre-gates looked up from the folded table.
        pre0 = gates0_all[t * Bp:(t + 1) * Bp, :]
        gates_l0 = pre0 + jnp.dot(h1, w_hh0, preferred_element_type=jnp.float32)
        h1, c1 = activate(gates_l0, c1)
        # layer 2 (top), cell t: fused input+recurrent weights, one MXU op.
        xh = jnp.concatenate([h1, h2], axis=1)                     # (Bp, 2H)
        gates_l1 = jnp.dot(xh, w_l1, preferred_element_type=jnp.float32) + b1
        h2, c2 = activate(gates_l1, c2)

    # TODO(synk): nn.LSTM inter-layer dropout and self.dropout apply only in
    # training mode; inference semantics (identity) are implemented here.

    # ---- FC + sigmoid on the top-layer hidden at the last timestep ----
    logits = jnp.dot(h2, fc_w_ref[...],
                     preferred_element_type=jnp.float32) + fc_b_ref[...]
    sig_ref[...] = jax.nn.sigmoid(logits)

    # Lane-dense packed state output: [h_l0 | h_l1 | c_l0 | c_l1] -> (Bp, 4H)
    state_ref[...] = jnp.concatenate([h1, h2, c1, c2], axis=1)


def sentiment_rnn_forward(x_tokens, hidden, params):
    """Equivalent of SentimentRNN.forward(x, hidden) in inference mode.

    x_tokens: int (B, T) token ids.
    hidden: tuple (h0, c0), each (n_layers, B, H).
    Returns (sig_out (B, 1), (h_n, c_n)).
    """
    h0, c0 = hidden
    B, T = x_tokens.shape
    H = HIDDEN_DIM

    # Pad batch to a multiple of 8 sublanes (full (8,128) tiles in the kernel).
    Bp = max(8, ((B + 7) // 8) * 8)
    pad = Bp - B

    # Clamp ids so the one-hot gather can never touch out-of-range rows.
    tok = jnp.clip(x_tokens.astype(jnp.int32), 0, VOCAB_SIZE - 1)
    tok_tm = jnp.transpose(jnp.pad(tok, ((0, pad), (0, 0))), (1, 0))   # (T, Bp)
    tok_col = tok_tm.reshape(T * Bp, 1)                                # (T*Bp, 1)

    h0_p = jnp.pad(h0, ((0, 0), (0, pad), (0, 0)))
    c0_p = jnp.pad(c0, ((0, 0), (0, pad), (0, 0)))

    # Scale g-gate columns by 2 so a single sigmoid covers all gates in-kernel.
    g_scale = jnp.ones((1, 4 * H), jnp.float32).at[:, 2 * H:3 * H].set(2.0)

    # Fold the embedding table into the layer-0 input projection (static weights),
    # pad vocab rows to a multiple of 128 so the contraction dim is lane-aligned.
    vocab_pad = ((VOCAB_SIZE + 127) // 128) * 128
    gates0_tbl = (params["embedding"] @ params["w_ih0"] + params["b0"]) * g_scale
    gates0_tbl = jnp.pad(gates0_tbl, ((0, vocab_pad - VOCAB_SIZE), (0, 0)))

    w_hh0_s = params["w_hh0"] * g_scale
    w_l1 = jnp.concatenate([params["w_ih1"], params["w_hh1"]], axis=0) * g_scale
    b1_s = params["b1"] * g_scale

    vmem = pl.BlockSpec(memory_space=pltpu.MemorySpace.VMEM)
    out_shapes = (
        jax.ShapeDtypeStruct((Bp, OUTPUT_SIZE), jnp.float32),
        jax.ShapeDtypeStruct((Bp, 4 * H), jnp.float32),
    )
    sig_p, state_p = pl.pallas_call(
        _lstm_fc_kernel,
        out_shape=out_shapes,
        in_specs=[vmem] * 9,
        out_specs=(vmem, vmem),
    )(tok_col, gates0_tbl, h0_p, c0_p,
      w_hh0_s, w_l1, b1_s,
      params["fc_w"], params["fc_b"])

    sig_out = sig_p[:B]
    h_n = jnp.stack([state_p[:B, 0 * H:1 * H], state_p[:B, 1 * H:2 * H]], axis=0)
    c_n = jnp.stack([state_p[:B, 2 * H:3 * H], state_p[:B, 3 * H:4 * H]], axis=0)
    return sig_out, (h_n, c_n)


def init_params(key):
    """Deterministic parameter init (PyTorch-style uniform(-1/sqrt(H), 1/sqrt(H)))."""
    ks = jax.random.split(key, 12)
    std = 1.0 / float(jnp.sqrt(jnp.float32(HIDDEN_DIM)))

    def u(k, shape):
        return jax.random.uniform(k, shape, jnp.float32, -std, std)

    return {
        "embedding": jax.random.normal(ks[0], (VOCAB_SIZE, EMBEDDING_DIM),
                                       jnp.float32),
        # gate weights stored transposed: (in_dim, 4H), gate order [i, f, g, o]
        "w_ih0": u(ks[1], (EMBEDDING_DIM, 4 * HIDDEN_DIM)),
        "w_hh0": u(ks[2], (HIDDEN_DIM, 4 * HIDDEN_DIM)),
        "b0":    u(ks[3], (1, 4 * HIDDEN_DIM)) + u(ks[4], (1, 4 * HIDDEN_DIM)),
        "w_ih1": u(ks[5], (HIDDEN_DIM, 4 * HIDDEN_DIM)),
        "w_hh1": u(ks[6], (HIDDEN_DIM, 4 * HIDDEN_DIM)),
        "b1":    u(ks[7], (1, 4 * HIDDEN_DIM)) + u(ks[8], (1, 4 * HIDDEN_DIM)),
        "fc_w":  u(ks[9], (HIDDEN_DIM, OUTPUT_SIZE)),
        "fc_b":  u(ks[10], (1, OUTPUT_SIZE)),
    }


if __name__ == "__main__":
    key = jax.random.PRNGKey(0)
    pkey, xkey = jax.random.split(key)
    params = init_params(pkey)

    B, T = 2, 8
    x_tokens = jax.random.randint(xkey, (B, T), 0, VOCAB_SIZE, dtype=jnp.int32)
    # init_hidden: zeros of shape (n_layers, batch, hidden_dim)
    hidden = (jnp.zeros((N_LAYERS, B, HIDDEN_DIM), jnp.float32),
              jnp.zeros((N_LAYERS, B, HIDDEN_DIM), jnp.float32))

    fwd = jax.jit(sentiment_rnn_forward)
    sig_out, (h_n, c_n) = fwd(x_tokens, hidden, params)
    jax.block_until_ready((sig_out, h_n, c_n))
    assert sig_out.shape == (B, OUTPUT_SIZE)
    assert h_n.shape == (N_LAYERS, B, HIDDEN_DIM)
    assert c_n.shape == (N_LAYERS, B, HIDDEN_DIM)
    print("KERNEL_OK")
</pallas_src>

<mosaic_0001>
module attributes {stable_mosaic.version = 11 : i64} {
  func.func @_lstm_fc_kernel(%arg0: memref<64x1xi32, #tpu.memory_space<vmem>>, %arg1: memref<512x128xf32, #tpu.memory_space<vmem>>, %arg2: memref<2x8x32xf32, #tpu.memory_space<vmem>>, %arg3: memref<2x8x32xf32, #tpu.memory_space<vmem>>, %arg4: memref<32x128xf32, #tpu.memory_space<vmem>>, %arg5: memref<64x128xf32, #tpu.memory_space<vmem>>, %arg6: memref<1x128xf32, #tpu.memory_space<vmem>>, %arg7: memref<32x1xf32, #tpu.memory_space<vmem>>, %arg8: memref<1x1xf32, #tpu.memory_space<vmem>>, %arg9: memref<8x1xf32, #tpu.memory_space<vmem>>, %arg10: memref<8x128xf32, #tpu.memory_space<vmem>>) attributes {dimension_semantics = [], scalar_prefetch = 0 : i64, scratch_operands = 0 : i64, tpu.core_type = #tpu.core_type<tc>} {
    %c0 = arith.constant 0 : index
    %c0_0 = arith.constant 0 : index
    %0 = vector.load %arg0[%c0, %c0_0] : memref<64x1xi32, #tpu.memory_space<vmem>>, vector<64x1xi32>
    %1 = tpu.iota {dimensions = array<i32: 1>} : vector<64x512xi32>
    %2 = vector.broadcast %0 : vector<64x1xi32> to vector<64x512xi32>
    %3 = arith.cmpi eq, %1, %2 : vector<64x512xi32>
    %4 = arith.extui %3 : vector<64x512xi1> to vector<64x512xi32>
    %5 = arith.sitofp %4 : vector<64x512xi32> to vector<64x512xf32>
    %c0_1 = arith.constant 0 : index
    %c0_2 = arith.constant 0 : index
    %6 = vector.load %arg1[%c0_1, %c0_2] : memref<512x128xf32, #tpu.memory_space<vmem>>, vector<512x128xf32>
    %cst = arith.constant dense<0.000000e+00> : vector<64x128xf32>
    %7 = tpu.matmul %5, %6, %cst {dimension_numbers = #tpu.dot_dimension_numbers<[1], [0], [0], [1], [0, 0, 1, 1], [], []>} : vector<64x512xf32>, vector<512x128xf32>, vector<64x128xf32> -> vector<64x128xf32>
    %c0_3 = arith.constant 0 : index
    %c0_4 = arith.constant 0 : index
    %8 = vector.load %arg4[%c0_3, %c0_4] : memref<32x128xf32, #tpu.memory_space<vmem>>, vector<32x128xf32>
    %c0_5 = arith.constant 0 : index
    %c0_6 = arith.constant 0 : index
    %9 = vector.load %arg5[%c0_5, %c0_6] : memref<64x128xf32, #tpu.memory_space<vmem>>, vector<64x128xf32>
    %c0_7 = arith.constant 0 : index
    %c0_8 = arith.constant 0 : index
    %10 = vector.load %arg6[%c0_7, %c0_8] : memref<1x128xf32, #tpu.memory_space<vmem>>, vector<1x128xf32>
    %11 = tpu.iota {dimensions = array<i32: 1>} : vector<8x128xi32>
    %c64_i32 = arith.constant 64 : i32
    %12 = vector.broadcast %c64_i32 : i32 to vector<8x128xi32>
    %13 = arith.cmpi sge, %11, %12 : vector<8x128xi32>
    %c96_i32 = arith.constant 96 : i32
    %14 = vector.broadcast %c96_i32 : i32 to vector<8x128xi32>
    %15 = arith.cmpi slt, %11, %14 : vector<8x128xi32>
    %16 = arith.andi %13, %15 : vector<8x128xi1>
    %c0_9 = arith.constant 0 : index
    %c0_10 = arith.constant 0 : index
    %c0_11 = arith.constant 0 : index
    %17 = vector.load %arg2[%c0_9, %c0_10, %c0_11] : memref<2x8x32xf32, #tpu.memory_space<vmem>>, vector<1x8x32xf32>
    %18 = vector.shape_cast %17 : vector<1x8x32xf32> to vector<8x32xf32>
    %c0_12 = arith.constant 0 : index
    %c0_13 = arith.constant 0 : index
    %c0_14 = arith.constant 0 : index
    %19 = vector.load %arg3[%c0_12, %c0_13, %c0_14] : memref<2x8x32xf32, #tpu.memory_space<vmem>>, vector<1x8x32xf32>
    %20 = vector.shape_cast %19 : vector<1x8x32xf32> to vector<8x32xf32>
    %c1 = arith.constant 1 : index
    %c0_15 = arith.constant 0 : index
    %c0_16 = arith.constant 0 : index
    %21 = vector.load %arg2[%c1, %c0_15, %c0_16] : memref<2x8x32xf32, #tpu.memory_space<vmem>>, vector<1x8x32xf32>
    %22 = vector.shape_cast %21 : vector<1x8x32xf32> to vector<8x32xf32>
    %c1_17 = arith.constant 1 : index
    %c0_18 = arith.constant 0 : index
    %c0_19 = arith.constant 0 : index
    %23 = vector.load %arg3[%c1_17, %c0_18, %c0_19] : memref<2x8x32xf32, #tpu.memory_space<vmem>>, vector<1x8x32xf32>
    %24 = vector.shape_cast %23 : vector<1x8x32xf32> to vector<8x32xf32>
    %25 = vector.extract_strided_slice %7 {offsets = [0, 0], sizes = [8, 128], strides = [1, 1]} : vector<64x128xf32> to vector<8x128xf32>
    %cst_20 = arith.constant dense<0.000000e+00> : vector<8x128xf32>
    %26 = tpu.matmul %18, %8, %cst_20 {dimension_numbers = #tpu.dot_dimension_numbers<[1], [0], [0], [1], [0, 0, 1, 1], [], []>} : vector<8x32xf32>, vector<32x128xf32>, vector<8x128xf32> -> vector<8x128xf32>
    %27 = arith.addf %25, %26 : vector<8x128xf32>
    %28 = arith.negf %27 : vector<8x128xf32>
    %29 = math.exp %28 : vector<8x128xf32>
    %cst_21 = arith.constant 1.000000e+00 : f32
    %30 = vector.broadcast %cst_21 : f32 to vector<8x128xf32>
    %31 = arith.addf %30, %29 : vector<8x128xf32>
    %32 = arith.divf %30, %31 : vector<8x128xf32>
    %cst_22 = arith.constant 2.000000e+00 : f32
    %33 = vector.broadcast %cst_22 : f32 to vector<8x128xf32>
    %34 = arith.mulf %33, %32 : vector<8x128xf32>
    %cst_23 = arith.constant 1.000000e+00 : f32
    %35 = vector.broadcast %cst_23 : f32 to vector<8x128xf32>
    %36 = arith.subf %34, %35 : vector<8x128xf32>
    %37 = arith.select %16, %36, %32 : vector<8x128xi1>, vector<8x128xf32>
    %38 = vector.extract_strided_slice %37 {offsets = [0, 0], sizes = [8, 32], strides = [1, 1]} : vector<8x128xf32> to vector<8x32xf32>
    %39 = vector.extract_strided_slice %37 {offsets = [0, 32], sizes = [8, 32], strides = [1, 1]} : vector<8x128xf32> to vector<8x32xf32>
    %40 = vector.extract_strided_slice %37 {offsets = [0, 64], sizes = [8, 32], strides = [1, 1]} : vector<8x128xf32> to vector<8x32xf32>
    %41 = vector.extract_strided_slice %37 {offsets = [0, 96], sizes = [8, 32], strides = [1, 1]} : vector<8x128xf32> to vector<8x32xf32>
    %42 = arith.mulf %39, %20 : vector<8x32xf32>
    %43 = arith.mulf %38, %40 : vector<8x32xf32>
    %44 = arith.addf %42, %43 : vector<8x32xf32>
    %45 = math.tanh %44 : vector<8x32xf32>
    %46 = arith.mulf %41, %45 : vector<8x32xf32>
    %47 = tpu.concatenate %46, %22 in 1 : vector<8x32xf32>, vector<8x32xf32> -> vector<8x64xf32>
    %cst_24 = arith.constant dense<0.000000e+00> : vector<8x128xf32>
    %48 = tpu.matmul %47, %9, %cst_24 {dimension_numbers = #tpu.dot_dimension_numbers<[1], [0], [0], [1], [0, 0, 1, 1], [], []>} : vector<8x64xf32>, vector<64x128xf32>, vector<8x128xf32> -> vector<8x128xf32>
    %49 = vector.broadcast %10 : vector<1x128xf32> to vector<8x128xf32>
    %50 = arith.addf %48, %49 : vector<8x128xf32>
    %51 = arith.negf %50 : vector<8x128xf32>
    %52 = math.exp %51 : vector<8x128xf32>
    %cst_25 = arith.constant 1.000000e+00 : f32
    %53 = vector.broadcast %cst_25 : f32 to vector<8x128xf32>
    %54 = arith.addf %53, %52 : vector<8x128xf32>
    %55 = arith.divf %53, %54 : vector<8x128xf32>
    %cst_26 = arith.constant 2.000000e+00 : f32
    %56 = vector.broadcast %cst_26 : f32 to vector<8x128xf32>
    %57 = arith.mulf %56, %55 : vector<8x128xf32>
    %cst_27 = arith.constant 1.000000e+00 : f32
    %58 = vector.broadcast %cst_27 : f32 to vector<8x128xf32>
    %59 = arith.subf %57, %58 : vector<8x128xf32>
    %60 = arith.select %16, %59, %55 : vector<8x128xi1>, vector<8x128xf32>
    %61 = vector.extract_strided_slice %60 {offsets = [0, 0], sizes = [8, 32], strides = [1, 1]} : vector<8x128xf32> to vector<8x32xf32>
    %62 = vector.extract_strided_slice %60 {offsets = [0, 32], sizes = [8, 32], strides = [1, 1]} : vector<8x128xf32> to vector<8x32xf32>
    %63 = vector.extract_strided_slice %60 {offsets = [0, 64], sizes = [8, 32], strides = [1, 1]} : vector<8x128xf32> to vector<8x32xf32>
    %64 = vector.extract_strided_slice %60 {offsets = [0, 96], sizes = [8, 32], strides = [1, 1]} : vector<8x128xf32> to vector<8x32xf32>
    %65 = arith.mulf %62, %24 : vector<8x32xf32>
    %66 = arith.mulf %61, %63 : vector<8x32xf32>
    %67 = arith.addf %65, %66 : vector<8x32xf32>
    %68 = math.tanh %67 : vector<8x32xf32>
    %69 = arith.mulf %64, %68 : vector<8x32xf32>
    %70 = vector.extract_strided_slice %7 {offsets = [8, 0], sizes = [8, 128], strides = [1, 1]} : vector<64x128xf32> to vector<8x128xf32>
    %cst_28 = arith.constant dense<0.000000e+00> : vector<8x128xf32>
    %71 = tpu.matmul %46, %8, %cst_28 {dimension_numbers = #tpu.dot_dimension_numbers<[1], [0], [0], [1], [0, 0, 1, 1], [], []>} : vector<8x32xf32>, vector<32x128xf32>, vector<8x128xf32> -> vector<8x128xf32>
    %72 = arith.addf %70, %71 : vector<8x128xf32>
    %73 = arith.negf %72 : vector<8x128xf32>
    %74 = math.exp %73 : vector<8x128xf32>
    %cst_29 = arith.constant 1.000000e+00 : f32
    %75 = vector.broadcast %cst_29 : f32 to vector<8x128xf32>
    %76 = arith.addf %75, %74 : vector<8x128xf32>
    %77 = arith.divf %75, %76 : vector<8x128xf32>
    %cst_30 = arith.constant 2.000000e+00 : f32
    %78 = vector.broadcast %cst_30 : f32 to vector<8x128xf32>
    %79 = arith.mulf %78, %77 : vector<8x128xf32>
    %cst_31 = arith.constant 1.000000e+00 : f32
    %80 = vector.broadcast %cst_31 : f32 to vector<8x128xf32>
    %81 = arith.subf %79, %80 : vector<8x128xf32>
    %82 = arith.select %16, %81, %77 : vector<8x128xi1>, vector<8x128xf32>
    %83 = vector.extract_strided_slice %82 {offsets = [0, 0], sizes = [8, 32], strides = [1, 1]} : vector<8x128xf32> to vector<8x32xf32>
    %84 = vector.extract_strided_slice %82 {offsets = [0, 32], sizes = [8, 32], strides = [1, 1]} : vector<8x128xf32> to vector<8x32xf32>
    %85 = vector.extract_strided_slice %82 {offsets = [0, 64], sizes = [8, 32], strides = [1, 1]} : vector<8x128xf32> to vector<8x32xf32>
    %86 = vector.extract_strided_slice %82 {offsets = [0, 96], sizes = [8, 32], strides = [1, 1]} : vector<8x128xf32> to vector<8x32xf32>
    %87 = arith.mulf %84, %44 : vector<8x32xf32>
    %88 = arith.mulf %83, %85 : vector<8x32xf32>
    %89 = arith.addf %87, %88 : vector<8x32xf32>
    %90 = math.tanh %89 : vector<8x32xf32>
    %91 = arith.mulf %86, %90 : vector<8x32xf32>
    %92 = tpu.concatenate %91, %69 in 1 : vector<8x32xf32>, vector<8x32xf32> -> vector<8x64xf32>
    %cst_32 = arith.constant dense<0.000000e+00> : vector<8x128xf32>
    %93 = tpu.matmul %92, %9, %cst_32 {dimension_numbers = #tpu.dot_dimension_numbers<[1], [0], [0], [1], [0, 0, 1, 1], [], []>} : vector<8x64xf32>, vector<64x128xf32>, vector<8x128xf32> -> vector<8x128xf32>
    %94 = vector.broadcast %10 : vector<1x128xf32> to vector<8x128xf32>
    %95 = arith.addf %93, %94 : vector<8x128xf32>
    %96 = arith.negf %95 : vector<8x128xf32>
    %97 = math.exp %96 : vector<8x128xf32>
    %cst_33 = arith.constant 1.000000e+00 : f32
    %98 = vector.broadcast %cst_33 : f32 to vector<8x128xf32>
    %99 = arith.addf %98, %97 : vector<8x128xf32>
    %100 = arith.divf %98, %99 : vector<8x128xf32>
    %cst_34 = arith.constant 2.000000e+00 : f32
    %101 = vector.broadcast %cst_34 : f32 to vector<8x128xf32>
    %102 = arith.mulf %101, %100 : vector<8x128xf32>
    %cst_35 = arith.constant 1.000000e+00 : f32
    %103 = vector.broadcast %cst_35 : f32 to vector<8x128xf32>
    %104 = arith.subf %102, %103 : vector<8x128xf32>
    %105 = arith.select %16, %104, %100 : vector<8x128xi1>, vector<8x128xf32>
    %106 = vector.extract_strided_slice %105 {offsets = [0, 0], sizes = [8, 32], strides = [1, 1]} : vector<8x128xf32> to vector<8x32xf32>
    %107 = vector.extract_strided_slice %105 {offsets = [0, 32], sizes = [8, 32], strides = [1, 1]} : vector<8x128xf32> to vector<8x32xf32>
    %108 = vector.extract_strided_slice %105 {offsets = [0, 64], sizes = [8, 32], strides = [1, 1]} : vector<8x128xf32> to vector<8x32xf32>
    %109 = vector.extract_strided_slice %105 {offsets = [0, 96], sizes = [8, 32], strides = [1, 1]} : vector<8x128xf32> to vector<8x32xf32>
    %110 = arith.mulf %107, %67 : vector<8x32xf32>
    %111 = arith.mulf %106, %108 : vector<8x32xf32>
    %112 = arith.addf %110, %111 : vector<8x32xf32>
    %113 = math.tanh %112 : vector<8x32xf32>
    %114 = arith.mulf %109, %113 : vector<8x32xf32>
    %115 = vector.extract_strided_slice %7 {offsets = [16, 0], sizes = [8, 128], strides = [1, 1]} : vector<64x128xf32> to vector<8x128xf32>
    %cst_36 = arith.constant dense<0.000000e+00> : vector<8x128xf32>
    %116 = tpu.matmul %91, %8, %cst_36 {dimension_numbers = #tpu.dot_dimension_numbers<[1], [0], [0], [1], [0, 0, 1, 1], [], []>} : vector<8x32xf32>, vector<32x128xf32>, vector<8x128xf32> -> vector<8x128xf32>
    %117 = arith.addf %115, %116 : vector<8x128xf32>
    %118 = arith.negf %117 : vector<8x128xf32>
    %119 = math.exp %118 : vector<8x128xf32>
    %cst_37 = arith.constant 1.000000e+00 : f32
    %120 = vector.broadcast %cst_37 : f32 to vector<8x128xf32>
    %121 = arith.addf %120, %119 : vector<8x128xf32>
    %122 = arith.divf %120, %121 : vector<8x128xf32>
    %cst_38 = arith.constant 2.000000e+00 : f32
    %123 = vector.broadcast %cst_38 : f32 to vector<8x128xf32>
    %124 = arith.mulf %123, %122 : vector<8x128xf32>
    %cst_39 = arith.constant 1.000000e+00 : f32
    %125 = vector.broadcast %cst_39 : f32 to vector<8x128xf32>
    %126 = arith.subf %124, %125 : vector<8x128xf32>
    %127 = arith.select %16, %126, %122 : vector<8x128xi1>, vector<8x128xf32>
    %128 = vector.extract_strided_slice %127 {offsets = [0, 0], sizes = [8, 32], strides = [1, 1]} : vector<8x128xf32> to vector<8x32xf32>
    %129 = vector.extract_strided_slice %127 {offsets = [0, 32], sizes = [8, 32], strides = [1, 1]} : vector<8x128xf32> to vector<8x32xf32>
    %130 = vector.extract_strided_slice %127 {offsets = [0, 64], sizes = [8, 32], strides = [1, 1]} : vector<8x128xf32> to vector<8x32xf32>
    %131 = vector.extract_strided_slice %127 {offsets = [0, 96], sizes = [8, 32], strides = [1, 1]} : vector<8x128xf32> to vector<8x32xf32>
    %132 = arith.mulf %129, %89 : vector<8x32xf32>
    %133 = arith.mulf %128, %130 : vector<8x32xf32>
    %134 = arith.addf %132, %133 : vector<8x32xf32>
    %135 = math.tanh %134 : vector<8x32xf32>
    %136 = arith.mulf %131, %135 : vector<8x32xf32>
    %137 = tpu.concatenate %136, %114 in 1 : vector<8x32xf32>, vector<8x32xf32> -> vector<8x64xf32>
    %cst_40 = arith.constant dense<0.000000e+00> : vector<8x128xf32>
    %138 = tpu.matmul %137, %9, %cst_40 {dimension_numbers = #tpu.dot_dimension_numbers<[1], [0], [0], [1], [0, 0, 1, 1], [], []>} : vector<8x64xf32>, vector<64x128xf32>, vector<8x128xf32> -> vector<8x128xf32>
    %139 = vector.broadcast %10 : vector<1x128xf32> to vector<8x128xf32>
    %140 = arith.addf %138, %139 : vector<8x128xf32>
    %141 = arith.negf %140 : vector<8x128xf32>
    %142 = math.exp %141 : vector<8x128xf32>
    %cst_41 = arith.constant 1.000000e+00 : f32
    %143 = vector.broadcast %cst_41 : f32 to vector<8x128xf32>
    %144 = arith.addf %143, %142 : vector<8x128xf32>
    %145 = arith.divf %143, %144 : vector<8x128xf32>
    %cst_42 = arith.constant 2.000000e+00 : f32
    %146 = vector.broadcast %cst_42 : f32 to vector<8x128xf32>
    %147 = arith.mulf %146, %145 : vector<8x128xf32>
    %cst_43 = arith.constant 1.000000e+00 : f32
    %148 = vector.broadcast %cst_43 : f32 to vector<8x128xf32>
    %149 = arith.subf %147, %148 : vector<8x128xf32>
    %150 = arith.select %16, %149, %145 : vector<8x128xi1>, vector<8x128xf32>
    %151 = vector.extract_strided_slice %150 {offsets = [0, 0], sizes = [8, 32], strides = [1, 1]} : vector<8x128xf32> to vector<8x32xf32>
    %152 = vector.extract_strided_slice %150 {offsets = [0, 32], sizes = [8, 32], strides = [1, 1]} : vector<8x128xf32> to vector<8x32xf32>
    %153 = vector.extract_strided_slice %150 {offsets = [0, 64], sizes = [8, 32], strides = [1, 1]} : vector<8x128xf32> to vector<8x32xf32>
    %154 = vector.extract_strided_slice %150 {offsets = [0, 96], sizes = [8, 32], strides = [1, 1]} : vector<8x128xf32> to vector<8x32xf32>
    %155 = arith.mulf %152, %112 : vector<8x32xf32>
    %156 = arith.mulf %151, %153 : vector<8x32xf32>
    %157 = arith.addf %155, %156 : vector<8x32xf32>
    %158 = math.tanh %157 : vector<8x32xf32>
    %159 = arith.mulf %154, %158 : vector<8x32xf32>
    %160 = vector.extract_strided_slice %7 {offsets = [24, 0], sizes = [8, 128], strides = [1, 1]} : vector<64x128xf32> to vector<8x128xf32>
    %cst_44 = arith.constant dense<0.000000e+00> : vector<8x128xf32>
    %161 = tpu.matmul %136, %8, %cst_44 {dimension_numbers = #tpu.dot_dimension_numbers<[1], [0], [0], [1], [0, 0, 1, 1], [], []>} : vector<8x32xf32>, vector<32x128xf32>, vector<8x128xf32> -> vector<8x128xf32>
    %162 = arith.addf %160, %161 : vector<8x128xf32>
    %163 = arith.negf %162 : vector<8x128xf32>
    %164 = math.exp %163 : vector<8x128xf32>
    %cst_45 = arith.constant 1.000000e+00 : f32
    %165 = vector.broadcast %cst_45 : f32 to vector<8x128xf32>
    %166 = arith.addf %165, %164 : vector<8x128xf32>
    %167 = arith.divf %165, %166 : vector<8x128xf32>
    %cst_46 = arith.constant 2.000000e+00 : f32
    %168 = vector.broadcast %cst_46 : f32 to vector<8x128xf32>
    %169 = arith.mulf %168, %167 : vector<8x128xf32>
    %cst_47 = arith.constant 1.000000e+00 : f32
    %170 = vector.broadcast %cst_47 : f32 to vector<8x128xf32>
    %171 = arith.subf %169, %170 : vector<8x128xf32>
    %172 = arith.select %16, %171, %167 : vector<8x128xi1>, vector<8x128xf32>
    %173 = vector.extract_strided_slice %172 {offsets = [0, 0], sizes = [8, 32], strides = [1, 1]} : vector<8x128xf32> to vector<8x32xf32>
    %174 = vector.extract_strided_slice %172 {offsets = [0, 32], sizes = [8, 32], strides = [1, 1]} : vector<8x128xf32> to vector<8x32xf32>
    %175 = vector.extract_strided_slice %172 {offsets = [0, 64], sizes = [8, 32], strides = [1, 1]} : vector<8x128xf32> to vector<8x32xf32>
    %176 = vector.extract_strided_slice %172 {offsets = [0, 96], sizes = [8, 32], strides = [1, 1]} : vector<8x128xf32> to vector<8x32xf32>
    %177 = arith.mulf %174, %134 : vector<8x32xf32>
    %178 = arith.mulf %173, %175 : vector<8x32xf32>
    %179 = arith.addf %177, %178 : vector<8x32xf32>
    %180 = math.tanh %179 : vector<8x32xf32>
    %181 = arith.mulf %176, %180 : vector<8x32xf32>
    %182 = tpu.concatenate %181, %159 in 1 : vector<8x32xf32>, vector<8x32xf32> -> vector<8x64xf32>
    %cst_48 = arith.constant dense<0.000000e+00> : vector<8x128xf32>
    %183 = tpu.matmul %182, %9, %cst_48 {dimension_numbers = #tpu.dot_dimension_numbers<[1], [0], [0], [1], [0, 0, 1, 1], [], []>} : vector<8x64xf32>, vector<64x128xf32>, vector<8x128xf32> -> vector<8x128xf32>
    %184 = vector.broadcast %10 : vector<1x128xf32> to vector<8x128xf32>
    %185 = arith.addf %183, %184 : vector<8x128xf32>
    %186 = arith.negf %185 : vector<8x128xf32>
    %187 = math.exp %186 : vector<8x128xf32>
    %cst_49 = arith.constant 1.000000e+00 : f32
    %188 = vector.broadcast %cst_49 : f32 to vector<8x128xf32>
    %189 = arith.addf %188, %187 : vector<8x128xf32>
    %190 = arith.divf %188, %189 : vector<8x128xf32>
    %cst_50 = arith.constant 2.000000e+00 : f32
    %191 = vector.broadcast %cst_50 : f32 to vector<8x128xf32>
    %192 = arith.mulf %191, %190 : vector<8x128xf32>
    %cst_51 = arith.constant 1.000000e+00 : f32
    %193 = vector.broadcast %cst_51 : f32 to vector<8x128xf32>
    %194 = arith.subf %192, %193 : vector<8x128xf32>
    %195 = arith.select %16, %194, %190 : vector<8x128xi1>, vector<8x128xf32>
    %196 = vector.extract_strided_slice %195 {offsets = [0, 0], sizes = [8, 32], strides = [1, 1]} : vector<8x128xf32> to vector<8x32xf32>
    %197 = vector.extract_strided_slice %195 {offsets = [0, 32], sizes = [8, 32], strides = [1, 1]} : vector<8x128xf32> to vector<8x32xf32>
    %198 = vector.extract_strided_slice %195 {offsets = [0, 64], sizes = [8, 32], strides = [1, 1]} : vector<8x128xf32> to vector<8x32xf32>
    %199 = vector.extract_strided_slice %195 {offsets = [0, 96], sizes = [8, 32], strides = [1, 1]} : vector<8x128xf32> to vector<8x32xf32>
    %200 = arith.mulf %197, %157 : vector<8x32xf32>
    %201 = arith.mulf %196, %198 : vector<8x32xf32>
    %202 = arith.addf %200, %201 : vector<8x32xf32>
    %203 = math.tanh %202 : vector<8x32xf32>
    %204 = arith.mulf %199, %203 : vector<8x32xf32>
    %205 = vector.extract_strided_slice %7 {offsets = [32, 0], sizes = [8, 128], strides = [1, 1]} : vector<64x128xf32> to vector<8x128xf32>
    %cst_52 = arith.constant dense<0.000000e+00> : vector<8x128xf32>
    %206 = tpu.matmul %181, %8, %cst_52 {dimension_numbers = #tpu.dot_dimension_numbers<[1], [0], [0], [1], [0, 0, 1, 1], [], []>} : vector<8x32xf32>, vector<32x128xf32>, vector<8x128xf32> -> vector<8x128xf32>
    %207 = arith.addf %205, %206 : vector<8x128xf32>
    %208 = arith.negf %207 : vector<8x128xf32>
    %209 = math.exp %208 : vector<8x128xf32>
    %cst_53 = arith.constant 1.000000e+00 : f32
    %210 = vector.broadcast %cst_53 : f32 to vector<8x128xf32>
    %211 = arith.addf %210, %209 : vector<8x128xf32>
    %212 = arith.divf %210, %211 : vector<8x128xf32>
    %cst_54 = arith.constant 2.000000e+00 : f32
    %213 = vector.broadcast %cst_54 : f32 to vector<8x128xf32>
    %214 = arith.mulf %213, %212 : vector<8x128xf32>
    %cst_55 = arith.constant 1.000000e+00 : f32
    %215 = vector.broadcast %cst_55 : f32 to vector<8x128xf32>
    %216 = arith.subf %214, %215 : vector<8x128xf32>
    %217 = arith.select %16, %216, %212 : vector<8x128xi1>, vector<8x128xf32>
    %218 = vector.extract_strided_slice %217 {offsets = [0, 0], sizes = [8, 32], strides = [1, 1]} : vector<8x128xf32> to vector<8x32xf32>
    %219 = vector.extract_strided_slice %217 {offsets = [0, 32], sizes = [8, 32], strides = [1, 1]} : vector<8x128xf32> to vector<8x32xf32>
    %220 = vector.extract_strided_slice %217 {offsets = [0, 64], sizes = [8, 32], strides = [1, 1]} : vector<8x128xf32> to vector<8x32xf32>
    %221 = vector.extract_strided_slice %217 {offsets = [0, 96], sizes = [8, 32], strides = [1, 1]} : vector<8x128xf32> to vector<8x32xf32>
    %222 = arith.mulf %219, %179 : vector<8x32xf32>
    %223 = arith.mulf %218, %220 : vector<8x32xf32>
    %224 = arith.addf %222, %223 : vector<8x32xf32>
    %225 = math.tanh %224 : vector<8x32xf32>
    %226 = arith.mulf %221, %225 : vector<8x32xf32>
    %227 = tpu.concatenate %226, %204 in 1 : vector<8x32xf32>, vector<8x32xf32> -> vector<8x64xf32>
    %cst_56 = arith.constant dense<0.000000e+00> : vector<8x128xf32>
    %228 = tpu.matmul %227, %9, %cst_56 {dimension_numbers = #tpu.dot_dimension_numbers<[1], [0], [0], [1], [0, 0, 1, 1], [], []>} : vector<8x64xf32>, vector<64x128xf32>, vector<8x128xf32> -> vector<8x128xf32>
    %229 = vector.broadcast %10 : vector<1x128xf32> to vector<8x128xf32>
    %230 = arith.addf %228, %229 : vector<8x128xf32>
    %231 = arith.negf %230 : vector<8x128xf32>
    %232 = math.exp %231 : vector<8x128xf32>
    %cst_57 = arith.constant 1.000000e+00 : f32
    %233 = vector.broadcast %cst_57 : f32 to vector<8x128xf32>
    %234 = arith.addf %233, %232 : vector<8x128xf32>
    %235 = arith.divf %233, %234 : vector<8x128xf32>
    %cst_58 = arith.constant 2.000000e+00 : f32
    %236 = vector.broadcast %cst_58 : f32 to vector<8x128xf32>
    %237 = arith.mulf %236, %235 : vector<8x128xf32>
    %cst_59 = arith.constant 1.000000e+00 : f32
    %238 = vector.broadcast %cst_59 : f32 to vector<8x128xf32>
    %239 = arith.subf %237, %238 : vector<8x128xf32>
    %240 = arith.select %16, %239, %235 : vector<8x128xi1>, vector<8x128xf32>
    %241 = vector.extract_strided_slice %240 {offsets = [0, 0], sizes = [8, 32], strides = [1, 1]} : vector<8x128xf32> to vector<8x32xf32>
    %242 = vector.extract_strided_slice %240 {offsets = [0, 32], sizes = [8, 32], strides = [1, 1]} : vector<8x128xf32> to vector<8x32xf32>
    %243 = vector.extract_strided_slice %240 {offsets = [0, 64], sizes = [8, 32], strides = [1, 1]} : vector<8x128xf32> to vector<8x32xf32>
    %244 = vector.extract_strided_slice %240 {offsets = [0, 96], sizes = [8, 32], strides = [1, 1]} : vector<8x128xf32> to vector<8x32xf32>
    %245 = arith.mulf %242, %202 : vector<8x32xf32>
    %246 = arith.mulf %241, %243 : vector<8x32xf32>
    %247 = arith.addf %245, %246 : vector<8x32xf32>
    %248 = math.tanh %247 : vector<8x32xf32>
    %249 = arith.mulf %244, %248 : vector<8x32xf32>
    %250 = vector.extract_strided_slice %7 {offsets = [40, 0], sizes = [8, 128], strides = [1, 1]} : vector<64x128xf32> to vector<8x128xf32>
    %cst_60 = arith.constant dense<0.000000e+00> : vector<8x128xf32>
    %251 = tpu.matmul %226, %8, %cst_60 {dimension_numbers = #tpu.dot_dimension_numbers<[1], [0], [0], [1], [0, 0, 1, 1], [], []>} : vector<8x32xf32>, vector<32x128xf32>, vector<8x128xf32> -> vector<8x128xf32>
    %252 = arith.addf %250, %251 : vector<8x128xf32>
    %253 = arith.negf %252 : vector<8x128xf32>
    %254 = math.exp %253 : vector<8x128xf32>
    %cst_61 = arith.constant 1.000000e+00 : f32
    %255 = vector.broadcast %cst_61 : f32 to vector<8x128xf32>
    %256 = arith.addf %255, %254 : vector<8x128xf32>
    %257 = arith.divf %255, %256 : vector<8x128xf32>
    %cst_62 = arith.constant 2.000000e+00 : f32
    %258 = vector.broadcast %cst_62 : f32 to vector<8x128xf32>
    %259 = arith.mulf %258, %257 : vector<8x128xf32>
    %cst_63 = arith.constant 1.000000e+00 : f32
    %260 = vector.broadcast %cst_63 : f32 to vector<8x128xf32>
    %261 = arith.subf %259, %260 : vector<8x128xf32>
    %262 = arith.select %16, %261, %257 : vector<8x128xi1>, vector<8x128xf32>
    %263 = vector.extract_strided_slice %262 {offsets = [0, 0], sizes = [8, 32], strides = [1, 1]} : vector<8x128xf32> to vector<8x32xf32>
    %264 = vector.extract_strided_slice %262 {offsets = [0, 32], sizes = [8, 32], strides = [1, 1]} : vector<8x128xf32> to vector<8x32xf32>
    %265 = vector.extract_strided_slice %262 {offsets = [0, 64], sizes = [8, 32], strides = [1, 1]} : vector<8x128xf32> to vector<8x32xf32>
    %266 = vector.extract_strided_slice %262 {offsets = [0, 96], sizes = [8, 32], strides = [1, 1]} : vector<8x128xf32> to vector<8x32xf32>
    %267 = arith.mulf %264, %224 : vector<8x32xf32>
    %268 = arith.mulf %263, %265 : vector<8x32xf32>
    %269 = arith.addf %267, %268 : vector<8x32xf32>
    %270 = math.tanh %269 : vector<8x32xf32>
    %271 = arith.mulf %266, %270 : vector<8x32xf32>
    %272 = tpu.concatenate %271, %249 in 1 : vector<8x32xf32>, vector<8x32xf32> -> vector<8x64xf32>
    %cst_64 = arith.constant dense<0.000000e+00> : vector<8x128xf32>
    %273 = tpu.matmul %272, %9, %cst_64 {dimension_numbers = #tpu.dot_dimension_numbers<[1], [0], [0], [1], [0, 0, 1, 1], [], []>} : vector<8x64xf32>, vector<64x128xf32>, vector<8x128xf32> -> vector<8x128xf32>
    %274 = vector.broadcast %10 : vector<1x128xf32> to vector<8x128xf32>
    %275 = arith.addf %273, %274 : vector<8x128xf32>
    %276 = arith.negf %275 : vector<8x128xf32>
    %277 = math.exp %276 : vector<8x128xf32>
    %cst_65 = arith.constant 1.000000e+00 : f32
    %278 = vector.broadcast %cst_65 : f32 to vector<8x128xf32>
    %279 = arith.addf %278, %277 : vector<8x128xf32>
    %280 = arith.divf %278, %279 : vector<8x128xf32>
    %cst_66 = arith.constant 2.000000e+00 : f32
    %281 = vector.broadcast %cst_66 : f32 to vector<8x128xf32>
    %282 = arith.mulf %281, %280 : vector<8x128xf32>
    %cst_67 = arith.constant 1.000000e+00 : f32
    %283 = vector.broadcast %cst_67 : f32 to vector<8x128xf32>
    %284 = arith.subf %282, %283 : vector<8x128xf32>
    %285 = arith.select %16, %284, %280 : vector<8x128xi1>, vector<8x128xf32>
    %286 = vector.extract_strided_slice %285 {offsets = [0, 0], sizes = [8, 32], strides = [1, 1]} : vector<8x128xf32> to vector<8x32xf32>
    %287 = vector.extract_strided_slice %285 {offsets = [0, 32], sizes = [8, 32], strides = [1, 1]} : vector<8x128xf32> to vector<8x32xf32>
    %288 = vector.extract_strided_slice %285 {offsets = [0, 64], sizes = [8, 32], strides = [1, 1]} : vector<8x128xf32> to vector<8x32xf32>
    %289 = vector.extract_strided_slice %285 {offsets = [0, 96], sizes = [8, 32], strides = [1, 1]} : vector<8x128xf32> to vector<8x32xf32>
    %290 = arith.mulf %287, %247 : vector<8x32xf32>
    %291 = arith.mulf %286, %288 : vector<8x32xf32>
    %292 = arith.addf %290, %291 : vector<8x32xf32>
    %293 = math.tanh %292 : vector<8x32xf32>
    %294 = arith.mulf %289, %293 : vector<8x32xf32>
    %295 = vector.extract_strided_slice %7 {offsets = [48, 0], sizes = [8, 128], strides = [1, 1]} : vector<64x128xf32> to vector<8x128xf32>
    %cst_68 = arith.constant dense<0.000000e+00> : vector<8x128xf32>
    %296 = tpu.matmul %271, %8, %cst_68 {dimension_numbers = #tpu.dot_dimension_numbers<[1], [0], [0], [1], [0, 0, 1, 1], [], []>} : vector<8x32xf32>, vector<32x128xf32>, vector<8x128xf32> -> vector<8x128xf32>
    %297 = arith.addf %295, %296 : vector<8x128xf32>
    %298 = arith.negf %297 : vector<8x128xf32>
    %299 = math.exp %298 : vector<8x128xf32>
    %cst_69 = arith.constant 1.000000e+00 : f32
    %300 = vector.broadcast %cst_69 : f32 to vector<8x128xf32>
    %301 = arith.addf %300, %299 : vector<8x128xf32>
    %302 = arith.divf %300, %301 : vector<8x128xf32>
    %cst_70 = arith.constant 2.000000e+00 : f32
    %303 = vector.broadcast %cst_70 : f32 to vector<8x128xf32>
    %304 = arith.mulf %303, %302 : vector<8x128xf32>
    %cst_71 = arith.constant 1.000000e+00 : f32
    %305 = vector.broadcast %cst_71 : f32 to vector<8x128xf32>
    %306 = arith.subf %304, %305 : vector<8x128xf32>
    %307 = arith.select %16, %306, %302 : vector<8x128xi1>, vector<8x128xf32>
    %308 = vector.extract_strided_slice %307 {offsets = [0, 0], sizes = [8, 32], strides = [1, 1]} : vector<8x128xf32> to vector<8x32xf32>
    %309 = vector.extract_strided_slice %307 {offsets = [0, 32], sizes = [8, 32], strides = [1, 1]} : vector<8x128xf32> to vector<8x32xf32>
    %310 = vector.extract_strided_slice %307 {offsets = [0, 64], sizes = [8, 32], strides = [1, 1]} : vector<8x128xf32> to vector<8x32xf32>
    %311 = vector.extract_strided_slice %307 {offsets = [0, 96], sizes = [8, 32], strides = [1, 1]} : vector<8x128xf32> to vector<8x32xf32>
    %312 = arith.mulf %309, %269 : vector<8x32xf32>
    %313 = arith.mulf %308, %310 : vector<8x32xf32>
    %314 = arith.addf %312, %313 : vector<8x32xf32>
    %315 = math.tanh %314 : vector<8x32xf32>
    %316 = arith.mulf %311, %315 : vector<8x32xf32>
    %317 = tpu.concatenate %316, %294 in 1 : vector<8x32xf32>, vector<8x32xf32> -> vector<8x64xf32>
    %cst_72 = arith.constant dense<0.000000e+00> : vector<8x128xf32>
    %318 = tpu.matmul %317, %9, %cst_72 {dimension_numbers = #tpu.dot_dimension_numbers<[1], [0], [0], [1], [0, 0, 1, 1], [], []>} : vector<8x64xf32>, vector<64x128xf32>, vector<8x128xf32> -> vector<8x128xf32>
    %319 = vector.broadcast %10 : vector<1x128xf32> to vector<8x128xf32>
    %320 = arith.addf %318, %319 : vector<8x128xf32>
    %321 = arith.negf %320 : vector<8x128xf32>
    %322 = math.exp %321 : vector<8x128xf32>
    %cst_73 = arith.constant 1.000000e+00 : f32
    %323 = vector.broadcast %cst_73 : f32 to vector<8x128xf32>
    %324 = arith.addf %323, %322 : vector<8x128xf32>
    %325 = arith.divf %323, %324 : vector<8x128xf32>
    %cst_74 = arith.constant 2.000000e+00 : f32
    %326 = vector.broadcast %cst_74 : f32 to vector<8x128xf32>
    %327 = arith.mulf %326, %325 : vector<8x128xf32>
    %cst_75 = arith.constant 1.000000e+00 : f32
    %328 = vector.broadcast %cst_75 : f32 to vector<8x128xf32>
    %329 = arith.subf %327, %328 : vector<8x128xf32>
    %330 = arith.select %16, %329, %325 : vector<8x128xi1>, vector<8x128xf32>
    %331 = vector.extract_strided_slice %330 {offsets = [0, 0], sizes = [8, 32], strides = [1, 1]} : vector<8x128xf32> to vector<8x32xf32>
    %332 = vector.extract_strided_slice %330 {offsets = [0, 32], sizes = [8, 32], strides = [1, 1]} : vector<8x128xf32> to vector<8x32xf32>
    %333 = vector.extract_strided_slice %330 {offsets = [0, 64], sizes = [8, 32], strides = [1, 1]} : vector<8x128xf32> to vector<8x32xf32>
    %334 = vector.extract_strided_slice %330 {offsets = [0, 96], sizes = [8, 32], strides = [1, 1]} : vector<8x128xf32> to vector<8x32xf32>
    %335 = arith.mulf %332, %292 : vector<8x32xf32>
    %336 = arith.mulf %331, %333 : vector<8x32xf32>
    %337 = arith.addf %335, %336 : vector<8x32xf32>
    %338 = math.tanh %337 : vector<8x32xf32>
    %339 = arith.mulf %334, %338 : vector<8x32xf32>
    %340 = vector.extract_strided_slice %7 {offsets = [56, 0], sizes = [8, 128], strides = [1, 1]} : vector<64x128xf32> to vector<8x128xf32>
    %cst_76 = arith.constant dense<0.000000e+00> : vector<8x128xf32>
    %341 = tpu.matmul %316, %8, %cst_76 {dimension_numbers = #tpu.dot_dimension_numbers<[1], [0], [0], [1], [0, 0, 1, 1], [], []>} : vector<8x32xf32>, vector<32x128xf32>, vector<8x128xf32> -> vector<8x128xf32>
    %342 = arith.addf %340, %341 : vector<8x128xf32>
    %343 = arith.negf %342 : vector<8x128xf32>
    %344 = math.exp %343 : vector<8x128xf32>
    %cst_77 = arith.constant 1.000000e+00 : f32
    %345 = vector.broadcast %cst_77 : f32 to vector<8x128xf32>
    %346 = arith.addf %345, %344 : vector<8x128xf32>
    %347 = arith.divf %345, %346 : vector<8x128xf32>
    %cst_78 = arith.constant 2.000000e+00 : f32
    %348 = vector.broadcast %cst_78 : f32 to vector<8x128xf32>
    %349 = arith.mulf %348, %347 : vector<8x128xf32>
    %cst_79 = arith.constant 1.000000e+00 : f32
    %350 = vector.broadcast %cst_79 : f32 to vector<8x128xf32>
    %351 = arith.subf %349, %350 : vector<8x128xf32>
    %352 = arith.select %16, %351, %347 : vector<8x128xi1>, vector<8x128xf32>
    %353 = vector.extract_strided_slice %352 {offsets = [0, 0], sizes = [8, 32], strides = [1, 1]} : vector<8x128xf32> to vector<8x32xf32>
    %354 = vector.extract_strided_slice %352 {offsets = [0, 32], sizes = [8, 32], strides = [1, 1]} : vector<8x128xf32> to vector<8x32xf32>
    %355 = vector.extract_strided_slice %352 {offsets = [0, 64], sizes = [8, 32], strides = [1, 1]} : vector<8x128xf32> to vector<8x32xf32>
    %356 = vector.extract_strided_slice %352 {offsets = [0, 96], sizes = [8, 32], strides = [1, 1]} : vector<8x128xf32> to vector<8x32xf32>
    %357 = arith.mulf %354, %314 : vector<8x32xf32>
    %358 = arith.mulf %353, %355 : vector<8x32xf32>
    %359 = arith.addf %357, %358 : vector<8x32xf32>
    %360 = math.tanh %359 : vector<8x32xf32>
    %361 = arith.mulf %356, %360 : vector<8x32xf32>
    %362 = tpu.concatenate %361, %339 in 1 : vector<8x32xf32>, vector<8x32xf32> -> vector<8x64xf32>
    %cst_80 = arith.constant dense<0.000000e+00> : vector<8x128xf32>
    %363 = tpu.matmul %362, %9, %cst_80 {dimension_numbers = #tpu.dot_dimension_numbers<[1], [0], [0], [1], [0, 0, 1, 1], [], []>} : vector<8x64xf32>, vector<64x128xf32>, vector<8x128xf32> -> vector<8x128xf32>
    %364 = vector.broadcast %10 : vector<1x128xf32> to vector<8x128xf32>
    %365 = arith.addf %363, %364 : vector<8x128xf32>
    %366 = arith.negf %365 : vector<8x128xf32>
    %367 = math.exp %366 : vector<8x128xf32>
    %cst_81 = arith.constant 1.000000e+00 : f32
    %368 = vector.broadcast %cst_81 : f32 to vector<8x128xf32>
    %369 = arith.addf %368, %367 : vector<8x128xf32>
    %370 = arith.divf %368, %369 : vector<8x128xf32>
    %cst_82 = arith.constant 2.000000e+00 : f32
    %371 = vector.broadcast %cst_82 : f32 to vector<8x128xf32>
    %372 = arith.mulf %371, %370 : vector<8x128xf32>
    %cst_83 = arith.constant 1.000000e+00 : f32
    %373 = vector.broadcast %cst_83 : f32 to vector<8x128xf32>
    %374 = arith.subf %372, %373 : vector<8x128xf32>
    %375 = arith.select %16, %374, %370 : vector<8x128xi1>, vector<8x128xf32>
    %376 = vector.extract_strided_slice %375 {offsets = [0, 0], sizes = [8, 32], strides = [1, 1]} : vector<8x128xf32> to vector<8x32xf32>
    %377 = vector.extract_strided_slice %375 {offsets = [0, 32], sizes = [8, 32], strides = [1, 1]} : vector<8x128xf32> to vector<8x32xf32>
    %378 = vector.extract_strided_slice %375 {offsets = [0, 64], sizes = [8, 32], strides = [1, 1]} : vector<8x128xf32> to vector<8x32xf32>
    %379 = vector.extract_strided_slice %375 {offsets = [0, 96], sizes = [8, 32], strides = [1, 1]} : vector<8x128xf32> to vector<8x32xf32>
    %380 = arith.mulf %377, %337 : vector<8x32xf32>
    %381 = arith.mulf %376, %378 : vector<8x32xf32>
    %382 = arith.addf %380, %381 : vector<8x32xf32>
    %383 = math.tanh %382 : vector<8x32xf32>
    %384 = arith.mulf %379, %383 : vector<8x32xf32>
    %c0_84 = arith.constant 0 : index
    %c0_85 = arith.constant 0 : index
    %385 = vector.load %arg7[%c0_84, %c0_85] : memref<32x1xf32, #tpu.memory_space<vmem>>, vector<32x1xf32>
    %cst_86 = arith.constant dense<0.000000e+00> : vector<8x1xf32>
    %386 = tpu.matmul %384, %385, %cst_86 {dimension_numbers = #tpu.dot_dimension_numbers<[1], [0], [0], [1], [0, 0, 1, 1], [], []>} : vector<8x32xf32>, vector<32x1xf32>, vector<8x1xf32> -> vector<8x1xf32>
    %c0_87 = arith.constant 0 : index
    %c0_88 = arith.constant 0 : index
    %387 = vector.load %arg8[%c0_87, %c0_88] : memref<1x1xf32, #tpu.memory_space<vmem>>, vector<1x1xf32>
    %388 = vector.broadcast %387 : vector<1x1xf32> to vector<8x1xf32>
    %389 = arith.addf %386, %388 : vector<8x1xf32>
    %390 = arith.negf %389 : vector<8x1xf32>
    %391 = math.exp %390 : vector<8x1xf32>
    %cst_89 = arith.constant 1.000000e+00 : f32
    %392 = vector.broadcast %cst_89 : f32 to vector<8x1xf32>
    %393 = arith.addf %392, %391 : vector<8x1xf32>
    %394 = arith.divf %392, %393 : vector<8x1xf32>
    %c0_90 = arith.constant 0 : index
    %c0_91 = arith.constant 0 : index
    %395 = vector.load %arg9[%c0_90, %c0_91] : memref<8x1xf32, #tpu.memory_space<vmem>>, vector<8x1xf32>
    tpu.vector_store %arg9[%c0_90, %c0_91], %394 {strides = array<i32>} : memref<8x1xf32, #tpu.memory_space<vmem>>, vector<8x1xf32>,
    %396 = tpu.concatenate %361, %384, %359, %382 in 1 : vector<8x32xf32>, vector<8x32xf32>, vector<8x32xf32>, vector<8x32xf32> -> vector<8x128xf32>
    %c0_92 = arith.constant 0 : index
    %c0_93 = arith.constant 0 : index
    %397 = vector.load %arg10[%c0_92, %c0_93] : memref<8x128xf32, #tpu.memory_space<vmem>>, vector<8x128xf32>
    tpu.vector_store %arg10[%c0_92, %c0_93], %396 {strides = array<i32>} : memref<8x128xf32, #tpu.memory_space<vmem>>, vector<8x128xf32>,
    return
  }
}

</mosaic_0001>

<bundles_post_ra>
// kernel: sentiment_rnn_forward.1
= control target key start
LH: loop header
LB: loop body
LE: loop exit
PB: predicated region body
PF: predicated region fallthrough
CT: control target
= control target key end

     0   :  { %v1801_v0 = vmov 0   ;;  %s1803_s21 = smov 32   ;;  %s2591_s0 = inlined_call_operand.vmem [shape: s32[64,1], index: 0, kind: input, shape index: {}]   ;;  %s2592_s1 = inlined_call_operand.vmem [shape: f32[512,128], index: 1, kind: input, shape index: {}]   ;;  %s2593_s4 = inlined_call_operand.vmem [shape: f32[32,128], index: 4, kind: input, shape index: {}]   ;;  %s2594_s3 = inlined_call_operand.vmem [shape: f32[2,8,32], index: 3, kind: input, shape index: {}]   ;;  %s2595_s2 = inlined_call_operand.vmem [shape: f32[2,8,32], index: 2, kind: input, shape index: {}]   ;;  %s2596_s5 = inlined_call_operand.vmem [shape: f32[64,128], index: 5, kind: input, shape index: {}]   ;;  %s2597_s6 = inlined_call_operand.vmem [shape: f32[1,128], index: 6, kind: input, shape index: {}]   ;;  %s2598_s7 = inlined_call_operand.vmem [shape: f32[32,1], index: 7, kind: input, shape index: {}]   ;;  %s2599_s8 = inlined_call_operand.<no memory space> [shape: f32[1,1], index: 8, kind: input, shape index: {}]   ;;  %s2600_s10 = inlined_call_operand.vmem [shape: f32[8,128], index: 10, kind: output, shape index: {1}]   ;;  %s2601_s9 = inlined_call_operand.vmem [shape: f32[8,1], index: 9, kind: output, shape index: {0}]  }
   0x1   :  { %1696 = vset.pattern.permute.xlu1 %v1801_v0  ;;  %1695 = vset.pattern.permute.xlu0 %v1801_v0  ;;  %v38_v1 = vld [vmem:[%s2591_s0 + $0x10] sm:$0xff]  ;;  %v36_v2 = vld [vmem:[%s2591_s0] sm:$0xff]  ;;  %v184_v4 = vld [vmem:[%s2592_s1 + $0x78] sm:$0xff] }
   0x2   :  { %56 = vperm.xlu1 %1696, %v38_v1   ;;  %50 = vperm.xlu0 %1695, %v36_v2   ;;  %v40_v3 = vld [vmem:[%s2591_s0 + $0x20] sm:$0xff]  ;;  %v200_v5 = vld [vmem:[%s2592_s1 + $0xf8] sm:$0xff]  ;;  %v183_v8 = vld [vmem:[%s2592_s1 + $0x70] sm:$0xff] }
   0x3   :  { %1697 = vset.pattern.permute.xlu2 %v1801_v0  ;;  %233 = vmatpush.msra.mxu0 %v184_v4  ;;  %v216_v6 = vld [vmem:[%s2592_s1 + $0x178] sm:$0xff]  ;;  %v199_v9 = vld [vmem:[%s2592_s1 + $0xf0] sm:$0xff]  ;;  %v182_v12 = vld [vmem:[%s2592_s1 + $0x68] sm:$0xff] }
   0x4   :  { %62 = vperm.xlu2 %1697, %v40_v3   ;;  %v232_v7 = vld [vmem:[%s2592_s1 + $0x1f8] sm:$0xff]  ;;  %274 = vmatpush.msra.mxu1 %v200_v5  ;;  %v215_v10 = vld [vmem:[%s2592_s1 + $0x170] sm:$0xff]  ;;  %v198_v13 = vld [vmem:[%s2592_s1 + $0xe8] sm:$0xff] }
   0x5   :  { %315 = vmatpush.msra.mxu2 %v216_v6  ;;  %356 = vmatpush.msra.mxu3 %v232_v7  ;;  %v231_v11 = vld [vmem:[%s2592_s1 + $0x1f0] sm:$0xff]  ;;  %v39_v14 = vld [vmem:[%s2591_s0 + $0x18] sm:$0xff]  ;;  %v37_v15 = vld [vmem:[%s2591_s0 + $0x8] sm:$0xff] }
   0x6   :  { %234 = vmatpush.msra.mxu0 %v183_v8  ;;  %275 = vmatpush.msra.mxu1 %v199_v9  ;;  %v214_v16 = vld [vmem:[%s2592_s1 + $0x168] sm:$0xff]  ;;  %v181_v18 = vld [vmem:[%s2592_s1 + $0x60] sm:$0xff]  ;;  %v180_v23 = vld [vmem:[%s2592_s1 + $0x58] sm:$0xff] }
   0x7   :  { %316 = vmatpush.msra.mxu2 %v215_v10  ;;  %357 = vmatpush.msra.mxu3 %v231_v11  ;;  %v230_v17 = vld [vmem:[%s2592_s1 + $0x1e8] sm:$0xff]  ;;  %v197_v20 = vld [vmem:[%s2592_s1 + $0xe0] sm:$0xff]  ;;  %v196_v24 = vld [vmem:[%s2592_s1 + $0xd8] sm:$0xff]  ;;  %v44_v11 = vlaneseq }
   0x8   :  { %235 = vmatpush.msra.mxu0 %v182_v12  ;;  %v41_v19 = vld [vmem:[%s2591_s0 + $0x28] sm:$0xff]  ;;  %276 = vmatpush.msra.mxu1 %v198_v13  ;;  %v213_v21 = vld [vmem:[%s2592_s1 + $0x160] sm:$0xff]  ;;  %v212_v25 = vld [vmem:[%s2592_s1 + $0x158] sm:$0xff] }
   0x9   :  { %317 = vmatpush.msra.mxu2 %v214_v16  ;;  %v229_v22 = vld [vmem:[%s2592_s1 + $0x1e0] sm:$0xff]  ;;  %358 = vmatpush.msra.mxu3 %v230_v17  ;;  %v228_v26 = vld [vmem:[%s2592_s1 + $0x1d8] sm:$0xff]  ;;  %v179_v27 = vld [vmem:[%s2592_s1 + $0x50] sm:$0xff]  ;;  %v2090_v12 = vand.u32 127, %v44_v11  ;;  %v1802_v17 = vmov 1.0  }
   0xa   :  { %59 = vperm.xlu1 %1696, %v39_v14   ;;  %53 = vperm.xlu0 %1695, %v37_v15   ;;  %v195_v28 = vld [vmem:[%s2592_s1 + $0xd0] sm:$0xff]  ;;  %v43_v31 = vld [vmem:[%s2591_s0 + $0x38] sm:$0xff]  ;;  %v178_v33 = vld [vmem:[%s2592_s1 + $0x48] sm:$0xff] }
   0xb   :  { %236 = vmatpush.msra.mxu0 %v181_v18  ;;  %277 = vmatpush.msra.mxu1 %v197_v20  ;;  %v211_v29 = vld [vmem:[%s2592_s1 + $0x150] sm:$0xff]  ;;  %v194_v34 = vld [vmem:[%s2592_s1 + $0xc8] sm:$0xff]  ;;  %v177_v37 = vld [vmem:[%s2592_s1 + $0x40] sm:$0xff]  ;;  %v2093_v13 = vadd.s32 128, %v2090_v12  ;;  %v2096_v14 = vadd.s32 256, %v2090_v12  ;;  %v2099_v15 = vadd.s32 384, %v2090_v12 }
   0xc   :  { %65 = vperm.xlu2 %1697, %v41_v19   ;;  %318 = vmatpush.msra.mxu2 %v213_v21  ;;  %v227_v30 = vld [vmem:[%s2592_s1 + $0x1d0] sm:$0xff]  ;;  %v210_v35 = vld [vmem:[%s2592_s1 + $0x148] sm:$0xff]  ;;  %v193_v38 = vld [vmem:[%s2592_s1 + $0xc0] sm:$0xff] }
   0xd   :  { %359 = vmatpush.msra.mxu3 %v229_v22  ;;  %237 = vmatpush.msra.mxu0 %v180_v23  ;;  %v42_v32 = vld [vmem:[%s2591_s0 + $0x30] sm:$0xff]  ;;  %v226_v36 = vld [vmem:[%s2592_s1 + $0x1c8] sm:$0xff]  ;;  %v209_v39 = vld [vmem:[%s2592_s1 + $0x140] sm:$0xff]  ;;  %s1804_s0 = smov 64  }
   0xe   :  { %278 = vmatpush.msra.mxu1 %v196_v24  ;;  %319 = vmatpush.msra.mxu2 %v212_v25  ;;  %v225_v40 = vld [vmem:[%s2592_s1 + $0x1c0] sm:$0xff]  ;;  %v176_v41 = vld [vmem:[%s2592_s1 + $0x38] sm:$0xff]  ;;  %v175_v45 = vld [vmem:[%s2592_s1 + $0x30] sm:$0xff] }
   0xf   :  { %360 = vmatpush.msra.mxu3 %v228_v26  ;;  %238 = vmatpush.msra.mxu0 %v179_v27  ;;  %v192_v42 = vld [vmem:[%s2592_s1 + $0xb8] sm:$0xff]  ;;  %v191_v46 = vld [vmem:[%s2592_s1 + $0xb0] sm:$0xff]  ;;  %v174_v49 = vld [vmem:[%s2592_s1 + $0x28] sm:$0xff] }
  0x10   :  { %279 = vmatpush.msra.mxu1 %v195_v28  ;;  %320 = vmatpush.msra.mxu2 %v211_v29  ;;  %v208_v43 = vld [vmem:[%s2592_s1 + $0x138] sm:$0xff]  ;;  %v207_v47 = vld [vmem:[%s2592_s1 + $0x130] sm:$0xff]  ;;  %v190_v50 = vld [vmem:[%s2592_s1 + $0xa8] sm:$0xff] }
  0x11   :  { %361 = vmatpush.msra.mxu3 %v227_v30  ;;  %239 = vmatpush.msra.mxu0 %v178_v33  ;;  %v224_v44 = vld [vmem:[%s2592_s1 + $0x1b8] sm:$0xff]  ;;  %v223_v48 = vld [vmem:[%s2592_s1 + $0x1b0] sm:$0xff]  ;;  %v206_v51 = vld [vmem:[%s2592_s1 + $0x128] sm:$0xff] }
  0x12   :  { %71 = vperm.xlu1 %1696, %v43_v31   ;;  %68 = vperm.xlu0 %1695, %v42_v32   ;;  %v222_v52 = vld [vmem:[%s2592_s1 + $0x1a8] sm:$0xff]  ;;  %v173_v53 = vld [vmem:[%s2592_s1 + $0x20] sm:$0xff]  ;;  %v172_v57 = vld [vmem:[%s2592_s1 + $0x18] sm:$0xff] }
  0x13   :  { %280 = vmatpush.msra.mxu1 %v194_v34  ;;  %321 = vmatpush.msra.mxu2 %v210_v35  ;;  %v189_v54 = vld [vmem:[%s2592_s1 + $0xa0] sm:$0xff]  ;;  %v188_v58 = vld [vmem:[%s2592_s1 + $0x98] sm:$0xff]  ;;  %v171_v61 = vld [vmem:[%s2592_s1 + $0x10] sm:$0xff] }
  0x14   :  { %362 = vmatpush.msra.mxu3 %v226_v36  ;;  %240 = vmatpush.msra.mxu0 %v177_v37  ;;  %v205_v55 = vld [vmem:[%s2592_s1 + $0x120] sm:$0xff]  ;;  %v204_v59 = vld [vmem:[%s2592_s1 + $0x118] sm:$0xff]  ;;  %v187_v62 = vld [vmem:[%s2592_s1 + $0x90] sm:$0xff] }
  0x15   :  { %281 = vmatpush.msra.mxu1 %v193_v38  ;;  %322 = vmatpush.msra.mxu2 %v209_v39  ;;  %v221_v56 = vld [vmem:[%s2592_s1 + $0x1a0] sm:$0xff]  ;;  %v220_v60 = vld [vmem:[%s2592_s1 + $0x198] sm:$0xff]  ;;  %v203_v63 = vld [vmem:[%s2592_s1 + $0x110] sm:$0xff] }
  0x16   :  { %363 = vmatpush.msra.mxu3 %v225_v40  ;;  %241 = vmatpush.msra.mxu0 %v176_v41  ;;  %v219_v0 = vld [vmem:[%s2592_s1 + $0x190] sm:$0xff]  ;;  %v170_v1 = vld [vmem:[%s2592_s1 + $0x8] sm:$0xff]  ;;  %v169_v5 = vld [vmem:[%s2592_s1] sm:$0xff] }
  0x17   :  { %282 = vmatpush.msra.mxu1 %v192_v42  ;;  %323 = vmatpush.msra.mxu2 %v208_v43  ;;  %v186_v2 = vld [vmem:[%s2592_s1 + $0x88] sm:$0xff]  ;;  %v185_v6 = vld [vmem:[%s2592_s1 + $0x80] sm:$0xff]  ;;  %v2079_v9 = vld [vmem:[%s2593_s4 + $0x18] sm:$0xff] }
  0x18   :  { %364 = vmatpush.msra.mxu3 %v224_v44  ;;  %242 = vmatpush.msra.mxu0 %v175_v45  ;;  %v202_v3 = vld [vmem:[%s2592_s1 + $0x108] sm:$0xff]  ;;  %v201_v7 = vld [vmem:[%s2592_s1 + $0x100] sm:$0xff]  ;;  %v2086_v10 = vld [vmem:[%s2593_s4 + $0x10] sm:$0xff] }
  0x19   :  { %283 = vmatpush.msra.mxu1 %v191_v46  ;;  %324 = vmatpush.msra.mxu2 %v207_v47  ;;  %v218_v4 = vld [vmem:[%s2592_s1 + $0x188] sm:$0xff]  ;;  %v217_v8 = vld [vmem:[%s2592_s1 + $0x180] sm:$0xff] }
  0x1a   :  { %365 = vmatpush.msra.mxu3 %v223_v48  ;;  %243 = vmatpush.msra.mxu0 %v174_v49  ;;  %v2112_v18 = vld [vmem:[%s2593_s4 + $0x8] sm:$0xff]  ;;  %v2135_v21 = vld [vmem:[%s2593_s4] sm:$0xff] }
  0x1b   :  { %284 = vmatpush.msra.mxu1 %v190_v50  ;;  %325 = vmatpush.msra.mxu2 %v206_v51  ;;  %v414_v24 = vld [vmem:[%s2594_s3] sm:$0xff] }
  0x1c   :  { %366 = vmatpush.msra.mxu3 %v222_v52  ;;  %244 = vmatpush.msra.mxu0 %v173_v53  ;;  %v413_v28 = vld [vmem:[%s2595_s2] sm:$0xff] }
  0x1d   :  { %285 = vmatpush.msra.mxu1 %v189_v54  ;;  %326 = vmatpush.msra.mxu2 %v205_v55 }
  0x1e   :  { %367 = vmatpush.msra.mxu3 %v221_v56  ;;  %245 = vmatpush.msra.mxu0 %v172_v57 }
  0x1f   :  { %286 = vmatpush.msra.mxu1 %v188_v58  ;;  %327 = vmatpush.msra.mxu2 %v204_v59 }
  0x20   :  { %368 = vmatpush.msra.mxu3 %v220_v60  ;;  %246 = vmatpush.msra.mxu0 %v171_v61 }
  0x21   :  { %287 = vmatpush.msra.mxu1 %v187_v62  ;;  %328 = vmatpush.msra.mxu2 %v203_v63 }
  0x22   :  { %369 = vmatpush.msra.mxu3 %v219_v0  ;;  %247 = vmatpush.msra.mxu0 %v170_v1 }
  0x23   :  { %288 = vmatpush.msra.mxu1 %v186_v2  ;;  %329 = vmatpush.msra.mxu2 %v202_v3 }
  0x24   :  { %370 = vmatpush.msra.mxu3 %v218_v4  ;;  %248 = vmatpush.msra.mxu0 %v169_v5 }
  0x25   :  { %289 = vmatpush.msra.mxu1 %v185_v6  ;;  %330 = vmatpush.msra.mxu2 %v201_v7 }
  0x26   :  { %371 = vmatpush.msra.mxu3 %v217_v8  ;;  %435 = vmatpush.msrb.mxu0 %v2079_v9 }
  0x27   :  { %580 = vmatpush.msrb.mxu2 %v2079_v9  ;;  %467 = vrot.lane.b32.xlu0 %v414_v24, %s1803_s21 }
  0x28   :  { %436 = vmatpush.msrb.mxu0 %v2086_v10 }
  0x29   :  { %581 = vmatpush.msrb.mxu2 %v2086_v10 }
  0x2a   :  { %437 = vmatpush.msrb.mxu0 %v2112_v18 }
  0x2b   :  { %582 = vmatpush.msrb.mxu2 %v2112_v18 }
  0x2c   :  { %438 = vmatpush.msrb.mxu0 %v2135_v21 }
  0x2d   :  { %583 = vmatpush.msrb.mxu2 %v2135_v21 }
  0x5e   :  { %v63_v23 = vpop.permute.xlu2 %62 }
  0x66   :  { %v66_v25 = vpop.permute.xlu2 %65 }
  0x74   :  { %v51_v16 = vpop.permute.xlu0 %50  ;;  %v57_v20 = vpop.permute.xlu1 %56 }
  0x75   :  { %vm73_vm0 = vcmp.eq.s32.totalorder %v2090_v12, %v51_v16  ;;  %vm74_vm1 = vcmp.eq.s32.totalorder %v2093_v13, %v51_v16  ;;  %vm75_vm2 = vcmp.eq.s32.totalorder %v2096_v14, %v51_v16  ;;  %vm76_vm3 = vcmp.eq.s32.totalorder %v2099_v15, %v51_v16 }
  0x76   :  { %1607 = vmatmul.msk.f32.vlgmr.msra.gmra.mxu0 %vm73_vm0, %v1802_v17  ;;  %1615 = vmatmul.msk.f32.vlgmr.msra.gmra.mxu1 %vm74_vm1, %v1802_v17  ;;  %vm81_vm8 = vcmp.eq.s32.totalorder %v2090_v12, %v57_v20  ;;  %vm82_vm9 = vcmp.eq.s32.totalorder %v2093_v13, %v57_v20  ;;  %vm83_vm10 = vcmp.eq.s32.totalorder %v2096_v14, %v57_v20 }
  0x77   :  { %1623 = vmatmul.msk.f32.vlgmr.msra.gmra.mxu2 %vm75_vm2, %v1802_v17  ;;  %1631 = vmatmul.msk.f32.vlgmr.msra.gmra.mxu3 %vm76_vm3, %v1802_v17  ;;  %vm84_vm11 = vcmp.eq.s32.totalorder %v2099_v15, %v57_v20  ;;  %vm89_vm0 = vcmp.eq.s32.totalorder %v2090_v12, %v63_v23  ;;  %vm90_vm1 = vcmp.eq.s32.totalorder %v2093_v13, %v63_v23 }
  0x78   :  { %713 = vmatpush.msra.mxu0 %v2079_v9  ;;  %846 = vmatpush.msra.mxu2 %v2079_v9  ;;  %vm91_vm2 = vcmp.eq.s32.totalorder %v2096_v14, %v63_v23  ;;  %vm92_vm3 = vcmp.eq.s32.totalorder %v2099_v15, %v63_v23 }
  0x7a   :  { %714 = vmatpush.msra.mxu0 %v2086_v10  ;;  %847 = vmatpush.msra.mxu2 %v2086_v10 }
  0x7c   :  { %v54_v19 = vpop.permute.xlu0 %53  ;;  %v60_v22 = vpop.permute.xlu1 %59  ;;  %715 = vmatpush.msra.mxu0 %v2112_v18  ;;  %848 = vmatpush.msra.mxu2 %v2112_v18 }
  0x7d   :  { %vm77_vm4 = vcmp.eq.s32.totalorder %v2090_v12, %v54_v19  ;;  %vm78_vm5 = vcmp.eq.s32.totalorder %v2093_v13, %v54_v19  ;;  %vm79_vm6 = vcmp.eq.s32.totalorder %v2096_v14, %v54_v19  ;;  %vm80_vm7 = vcmp.eq.s32.totalorder %v2099_v15, %v54_v19 }
  0x7e   :  { %1608 = vmatmul.msk.f32.gmra.mxu0 %vm77_vm4, %v1802_v17  ;;  %1616 = vmatmul.msk.f32.gmra.mxu1 %vm78_vm5, %v1802_v17  ;;  %vm85_vm12 = vcmp.eq.s32.totalorder %v2090_v12, %v60_v22  ;;  %vm86_vm13 = vcmp.eq.s32.totalorder %v2093_v13, %v60_v22  ;;  %vm87_vm14 = vcmp.eq.s32.totalorder %v2096_v14, %v60_v22 }
  0x7f   :  { %1624 = vmatmul.msk.f32.gmra.mxu2 %vm79_vm6, %v1802_v17  ;;  %1632 = vmatmul.msk.f32.gmra.mxu3 %vm80_vm7, %v1802_v17  ;;  %vm88_vm15 = vcmp.eq.s32.totalorder %v2099_v15, %v60_v22  ;;  %vm93_vm4 = vcmp.eq.s32.totalorder %v2090_v12, %v66_v25  ;;  %vm94_vm5 = vcmp.eq.s32.totalorder %v2093_v13, %v66_v25 }
  0x80   :  { %716 = vmatpush.msra.mxu0 %v2135_v21  ;;  %849 = vmatpush.msra.mxu2 %v2135_v21  ;;  %vm95_vm6 = vcmp.eq.s32.totalorder %v2096_v14, %v66_v25  ;;  %vm96_vm7 = vcmp.eq.s32.totalorder %v2099_v15, %v66_v25 }
  0x84   :  { %v69_v26 = vpop.permute.xlu0 %68  ;;  %v72_v27 = vpop.permute.xlu1 %71 }
  0x86   :  { %1609 = vmatmul.msk.f32.gmra.mxu0 %vm81_vm8, %v1802_v17  ;;  %1617 = vmatmul.msk.f32.gmra.mxu1 %vm82_vm9, %v1802_v17  ;;  %vm97_vm8 = vcmp.eq.s32.totalorder %v2090_v12, %v69_v26  ;;  %vm98_vm9 = vcmp.eq.s32.totalorder %v2093_v13, %v69_v26 }
  0x87   :  { %1625 = vmatmul.msk.f32.gmra.mxu2 %vm83_vm10, %v1802_v17  ;;  %1633 = vmatmul.msk.f32.gmra.mxu3 %vm84_vm11, %v1802_v17  ;;  %vm99_vm10 = vcmp.eq.s32.totalorder %v2096_v14, %v69_v26  ;;  %vm100_vm11 = vcmp.eq.s32.totalorder %v2099_v15, %v69_v26 }
  0x8e   :  { %1610 = vmatmul.msk.f32.gmra.mxu0 %vm85_vm12, %v1802_v17  ;;  %1618 = vmatmul.msk.f32.gmra.mxu1 %vm86_vm13, %v1802_v17  ;;  %vm101_vm12 = vcmp.eq.s32.totalorder %v2090_v12, %v72_v27  ;;  %vm102_vm13 = vcmp.eq.s32.totalorder %v2093_v13, %v72_v27 }
  0x8f   :  { %1626 = vmatmul.msk.f32.gmra.mxu2 %vm87_vm14, %v1802_v17  ;;  %1634 = vmatmul.msk.f32.gmra.mxu3 %vm88_vm15, %v1802_v17  ;;  %vm103_vm14 = vcmp.eq.s32.totalorder %v2096_v14, %v72_v27  ;;  %vm104_vm15 = vcmp.eq.s32.totalorder %v2099_v15, %v72_v27 }
  0x96   :  { %1611 = vmatmul.msk.f32.gmra.mxu0 %vm89_vm0, %v1802_v17  ;;  %1619 = vmatmul.msk.f32.gmra.mxu1 %vm90_vm1, %v1802_v17  ;;  %vm419_vm0 = vcmask 261120  }
  0x97   :  { %1627 = vmatmul.msk.f32.gmra.mxu2 %vm91_vm2, %v1802_v17  ;;  %1635 = vmatmul.msk.f32.gmra.mxu3 %vm92_vm3, %v1802_v17 }
  0x9e   :  { %1612 = vmatmul.msk.f32.gmra.mxu0 %vm93_vm4, %v1802_v17  ;;  %1620 = vmatmul.msk.f32.gmra.mxu1 %vm94_vm5, %v1802_v17  ;;  %vm410_vm4 = vcmp.ge.s32.totalorder %v2090_v12, 64  ;;  %vm411_vm5 = vcmp.lt.s32.totalorder %v2090_v12, 96  ;;  %v468_v12 = vpop.permute.xlu0 %467 }
  0x9f   :  { %1628 = vmatmul.msk.f32.gmra.mxu2 %vm95_vm6, %v1802_v17  ;;  %1636 = vmatmul.msk.f32.gmra.mxu3 %vm96_vm7, %v1802_v17  ;;  %vm2223_vm7 = vmand %vm410_vm4, %vm411_vm5 }
  0xa6   :  { %1613 = vmatmul.msk.f32.gmra.mxu0 %vm97_vm8, %v1802_v17  ;;  %1621 = vmatmul.msk.f32.gmra.mxu1 %vm98_vm9, %v1802_v17  ;;  %vm499_vm8 = vcmask 523264  }
  0xa7   :  { %1629 = vmatmul.msk.f32.gmra.mxu2 %vm99_vm10, %v1802_v17  ;;  %1637 = vmatmul.msk.f32.gmra.mxu3 %vm100_vm11, %v1802_v17 }
  0xae   :  { %1614 = vmatmul.msk.f32.gmra.mxu0 %vm101_vm12, %v1802_v17  ;;  %1622 = vmatmul.msk.f32.gmra.mxu1 %vm102_vm13, %v1802_v17 }
  0xaf   :  { %1630 = vmatmul.msk.f32.gmra.mxu2 %vm103_vm14, %v1802_v17  ;;  %1638 = vmatmul.msk.f32.gmra.mxu3 %vm104_vm15, %v1802_v17 }
  0xb6   :  { %1641 = vmatmul.msk.f32.vlgmr.msrb.gmra.mxu0 %vm419_vm0, %v413_v28 }
  0xb7   :  { %979 = vmatpush.msrb.mxu0 %v2079_v9 }
  0xb9   :  { %980 = vmatpush.msrb.mxu0 %v2086_v10 }
  0xbb   :  { %981 = vmatpush.msrb.mxu0 %v2112_v18 }
  0xbd   :  { %982 = vmatpush.msrb.mxu0 %v2135_v21 }
  0xf3   :  { %v250_v29 = vpop.f32.mrf.mxu0  ;;  %v291_v30 = vpop.f32.mrf.mxu1 }
  0xf4   :  { %v292_v6 = vadd.f32 %v291_v30, %v250_v29 }
  0xfa   :  { %v332_v31 = vpop.f32.mrf.mxu2  ;;  %v373_v32 = vpop.f32.mrf.mxu3 }
  0xfb   :  { %v2199_v33 = vpop.f32.mrf.mxu0  ;;  %v2201_v34 = vpop.f32.mrf.mxu1  ;;  %v333_v11 = vadd.f32 %v332_v31, %v292_v6 }
  0xfd   :  { %v374_v13 = vadd.f32 %v373_v32, %v333_v11  ;;  %v1500_v32 = vld [vmem:[%s2598_s7 + $0x18] sm:$0xff] }
 0x102   :  { %v2203_v35 = vpop.f32.mrf.mxu2  ;;  %v2205_v36 = vpop.f32.mrf.mxu3 }
 0x103   :  { %v256_v37 = vpop.f32.mrf.mxu0  ;;  %v297_v38 = vpop.f32.mrf.mxu1 }
 0x104   :  { %v298_v39 = vadd.f32 %v297_v38, %v256_v37 }
 0x10a   :  { %v338_v40 = vpop.f32.mrf.mxu2  ;;  %v2207_v41 = vpop.f32.mrf.mxu3 }
 0x10b   :  { %v2209_v42 = vadd.f32 %v338_v40, %v298_v39  ;;  %v259_v43 = vpop.f32.mrf.mxu0  ;;  %v300_v44 = vpop.f32.mrf.mxu1 }
 0x10c   :  { %v301_v45 = vadd.f32 %v300_v44, %v259_v43 }
 0x112   :  { %v341_v46 = vpop.f32.mrf.mxu2  ;;  %v382_v47 = vpop.f32.mrf.mxu3 }
 0x113   :  { %v342_v48 = vadd.f32 %v341_v46, %v301_v45  ;;  %v262_v49 = vpop.f32.mrf.mxu0  ;;  %v303_v50 = vpop.f32.mrf.mxu1 }
 0x114   :  { %v304_v51 = vadd.f32 %v303_v50, %v262_v49  ;;  %v2247_v49 = vld [vmem:[%s2596_s5 + $0x30] sm:$0xff]  ;;  %v2254_v50 = vld [vmem:[%s2596_s5 + $0x28] sm:$0xff] }
 0x115   :  { %v2211_v52 = vadd.f32 %v382_v47, %v342_v48  ;;  %v1639_v47 = vld [vmem:[%s2595_s2 + $0x8] sm:$0xff]  ;;  %v2242_v48 = vld [vmem:[%s2596_s5 + $0x38] sm:$0xff] }
 0x116   :  { %511 = vmatpush.msrb.mxu1 %v2242_v48  ;;  %648 = vmatpush.msrb.mxu3 %v2242_v48 }
 0x118   :  { %512 = vmatpush.msrb.mxu1 %v2247_v49  ;;  %649 = vmatpush.msrb.mxu3 %v2247_v49 }
 0x11a   :  { %v344_v53 = vpop.f32.mrf.mxu2  ;;  %v385_v54 = vpop.f32.mrf.mxu3  ;;  %513 = vmatpush.msrb.mxu1 %v2254_v50  ;;  %650 = vmatpush.msrb.mxu3 %v2254_v50 }
 0x11b   :  { %v345_v55 = vadd.f32 %v344_v53, %v304_v51  ;;  %v265_v56 = vpop.f32.mrf.mxu0  ;;  %v306_v57 = vpop.f32.mrf.mxu1  ;;  %v2261_v51 = vld [vmem:[%s2596_s5 + $0x20] sm:$0xff]  ;;  %v2268_v53 = vld [vmem:[%s2596_s5 + $0x18] sm:$0xff] }
 0x11c   :  { %v307_v58 = vadd.f32 %v306_v57, %v265_v56  ;;  %514 = vmatpush.msrb.mxu1 %v2261_v51  ;;  %651 = vmatpush.msrb.mxu3 %v2261_v51 }
 0x11d   :  { %v2213_v59 = vadd.f32 %v385_v54, %v345_v55  ;;  %v2275_v54 = vld [vmem:[%s2596_s5 + $0x10] sm:$0xff]  ;;  %v2282_v55 = vld [vmem:[%s2596_s5 + $0x8] sm:$0xff] }
 0x11e   :  { %515 = vmatpush.msrb.mxu1 %v2268_v53  ;;  %652 = vmatpush.msrb.mxu3 %v2268_v53 }
 0x120   :  { %516 = vmatpush.msrb.mxu1 %v2275_v54  ;;  %653 = vmatpush.msrb.mxu3 %v2275_v54 }
 0x122   :  { %v347_v60 = vpop.f32.mrf.mxu2  ;;  %v388_v61 = vpop.f32.mrf.mxu3  ;;  %517 = vmatpush.msrb.mxu1 %v2282_v55  ;;  %654 = vmatpush.msrb.mxu3 %v2282_v55 }
 0x123   :  { %v348_v62 = vadd.f32 %v347_v60, %v307_v58  ;;  %v268_v63 = vpop.f32.mrf.mxu0  ;;  %v309_v0 = vpop.f32.mrf.mxu1  ;;  %v2292_v58 = vld [vmem:[%s2596_s5] sm:$0xff]  ;;  %v1640_v60 = vld [vmem:[%s2594_s3 + $0x8] sm:$0xff] }
 0x124   :  { %v310_v1 = vadd.f32 %v309_v0, %v268_v63  ;;  %518 = vmatpush.msrb.mxu1 %v2292_v58  ;;  %655 = vmatpush.msrb.mxu3 %v2292_v58 }
 0x125   :  { %v2215_v2 = vadd.f32 %v388_v61, %v348_v62 }
 0x126   :  { %781 = vmatpush.msra.mxu1 %v2242_v48  ;;  %914 = vmatpush.msra.mxu3 %v2242_v48 }
 0x128   :  { %782 = vmatpush.msra.mxu1 %v2247_v49  ;;  %915 = vmatpush.msra.mxu3 %v2247_v49 }
 0x12a   :  { %v350_v3 = vpop.f32.mrf.mxu2  ;;  %v391_v7 = vpop.f32.mrf.mxu3  ;;  %783 = vmatpush.msra.mxu1 %v2254_v50  ;;  %916 = vmatpush.msra.mxu3 %v2254_v50 }
 0x12b   :  { %v351_v4 = vadd.f32 %v350_v3, %v310_v1  ;;  %v2217_v5 = vpop.f32.mrf.mxu0  ;;  %v2335_v0 = vpop.f32.mrf.mxu1  ;;  %v2342_v3 = vld [vmem:[%s2597_s6] ss:$0 sm:$0xff] }
 0x12c   :  { %784 = vmatpush.msra.mxu1 %v2261_v51  ;;  %917 = vmatpush.msra.mxu3 %v2261_v51 }
 0x12d   :  { %v2219_v8 = vadd.f32 %v391_v7, %v351_v4  ;;  %v295_v4 = vadd.f32 %v2201_v34, %v2199_v33 }
 0x12e   :  { %785 = vmatpush.msra.mxu1 %v2268_v53  ;;  %918 = vmatpush.msra.mxu3 %v2268_v53 }
 0x12f   :  { %v336_v6 = vadd.f32 %v2203_v35, %v295_v4 }
 0x130   :  { %786 = vmatpush.msra.mxu1 %v2275_v54  ;;  %919 = vmatpush.msra.mxu3 %v2275_v54 }
 0x132   :  { %787 = vmatpush.msra.mxu1 %v2282_v55  ;;  %920 = vmatpush.msra.mxu3 %v2282_v55  ;;  %v2337_v1 = vpop.f32.mrf.mxu2 }
 0x133   :  { %v440_v14 = vpop.f32.mrf.mxu0 }
 0x134   :  { %v443_v15 = vadd.f32 %v440_v14, %v374_v13  ;;  %788 = vmatpush.msra.mxu1 %v2292_v58  ;;  %921 = vmatpush.msra.mxu3 %v2292_v58  ;;  %v377_v14 = vadd.f32 %v2205_v36, %v336_v6 }
 0x136   :  { %v1642_v16 = vmul.f32 -1.442695, %v443_v15 }
 0x138   :  { %1700 = vpow2.f32 %v1642_v16 }
 0x13e   :  { %v1701_v17 = vpop.eup %1700 }
 0x13f   :  { %v447_v19 = vadd.f32 1.0, %v1701_v17 }
 0x141   :  { %1702 = vrcp.f32 %v447_v19  ;;  %v459_v24 = vand.u32 2147483648, %v447_v19  ;;  %v457_v26 = vand.u32 2147483647, %v447_v19  ;;  %vm453_vm2 = vweird.f32 %v447_v19 }
 0x143   :  { %v460_v28 = vor.u32 1.1754944e-38, %v459_v24  ;;  %vm458_vm6 = vcmp.eq.f32.partialorder %v457_v26, 8.507059e+37 }
 0x147   :  { %v1703_v20 = vpop.eup %1702 }
 0x148   :  { %v449_v22 = vmul.f32 %v1703_v20, %v447_v19  ;;  %vm454_vm1 = vweird.f32 %v1703_v20 }
 0x149   :  { %vm455_vm3 = vmor %vm453_vm2, %vm454_vm1 }
 0x14a   :  { %v450_v23 = vsub.f32 1.0, %v449_v22 }
 0x14c   :  { %v451_v25 = vmul.f32 %v1703_v20, %v450_v23 }
 0x14e   :  { %v452_v27 = vadd.f32 %v1703_v20, %v451_v25 }
 0x150   :  { %v456_v29 = vsel %vm455_vm3, %v1703_v20, %v452_v27 }
 0x151   :  { %v461_v30 = vsel %vm458_vm6, %v460_v28, %v456_v29 }
 0x152   :  { %v463_v31 = vmul.f32 2.0, %v461_v30 }
 0x154   :  { %v1643_v37 = vadd.f32 -1.0, %v463_v31 }
 0x156   :  { %v465_v38 = vsel %vm2223_vm7, %v1643_v37, %v461_v30 }
 0x157   :  { %472 = vrot.lane.b32.xlu2 %v465_v38, %s1804_s0  ;;  %v470_v43 = vmul.f32 %v468_v12, %v465_v38 }
 0x1b1   :  { %v473_v39 = vpop.permute.xlu2 %472 }
 0x1b2   :  { %v475_v40 = vmul.f32 %v473_v39, %v465_v38 }
 0x1b4   :  { %477 = vrot.lane.b32.xlu1 %v475_v40, %s1803_s21 }
 0x1bc   :  { %492 = vrot.lane.b32.xlu1 %v1639_v47, %s1803_s21 }
 0x1c4   :  { %546 = vrot.lane.b32.xlu1 %v1640_v60, %s1803_s21 }
 0x226   :  { %v478_v44 = vpop.permute.xlu1 %477 }
 0x227   :  { %v2231_v45 = vadd.f32 %v478_v44, %v470_v43 }
 0x229   :  { %1704 = vtanh.f32 %v2231_v45 }
 0x22e   :  { %v493_v61 = vpop.permute.xlu1 %492 }
 0x22f   :  { %v1705_v46 = vpop.eup %1704 }
 0x230   :  { %483 = vrot.lane.b32.xlu2 %v1705_v46, %s1804_s0 }
 0x28a   :  { %v484_v56 = vpop.permute.xlu2 %483 }
 0x28b   :  { %v486_v57 = vmul.f32 %v484_v56, %v465_v38 }
 0x28d   :  { %488 = vrot.lane.b32.xlu0 %v486_v57, %s1803_s21 }
 0x2ff   :  { %v489_v62 = vpop.permute.xlu0 %488 }
 0x300   :  { %v495_v63 = vsel %vm419_vm0, %v489_v62, %v493_v61  ;;  %1647 = vmatmul.msk.f32.vlgmr.msrb.gmra.mxu2 %vm419_vm0, %v489_v62 }
 0x301   :  { %1644 = vmatmul.msk.f32.vlgmr.msrb.gmra.mxu1 %vm499_vm8, %v495_v63  ;;  %1047 = vmatpush.msrb.mxu2 %v2242_v48 }
 0x302   :  { %1180 = vmatpush.msrb.mxu1 %v2242_v48 }
 0x303   :  { %1048 = vmatpush.msrb.mxu2 %v2247_v49 }
 0x304   :  { %1181 = vmatpush.msrb.mxu1 %v2247_v49 }
 0x305   :  { %1049 = vmatpush.msrb.mxu2 %v2254_v50 }
 0x306   :  { %1182 = vmatpush.msrb.mxu1 %v2254_v50 }
 0x307   :  { %1050 = vmatpush.msrb.mxu2 %v2261_v51 }
 0x308   :  { %1183 = vmatpush.msrb.mxu1 %v2261_v51 }
 0x309   :  { %1051 = vmatpush.msrb.mxu2 %v2268_v53 }
 0x30a   :  { %1184 = vmatpush.msrb.mxu1 %v2268_v53 }
 0x30b   :  { %1052 = vmatpush.msrb.mxu2 %v2275_v54 }
 0x30c   :  { %1185 = vmatpush.msrb.mxu1 %v2275_v54 }
 0x30d   :  { %1053 = vmatpush.msrb.mxu2 %v2282_v55 }
 0x30e   :  { %1186 = vmatpush.msrb.mxu1 %v2282_v55 }
 0x30f   :  { %1054 = vmatpush.msrb.mxu2 %v2292_v58 }
 0x310   :  { %1187 = vmatpush.msrb.mxu1 %v2292_v58 }
 0x37e   :  { %v520_v7 = vpop.f32.mrf.mxu1 }
 0x37f   :  { %v521_v11 = vadd.f32 %v2342_v3, %v520_v7 }
 0x381   :  { %v1645_v13 = vmul.f32 -1.442695, %v521_v11  ;;  %v547_v11 = vpop.permute.xlu1 %546 }
 0x383   :  { %1706 = vpow2.f32 %v1645_v13  ;;  %v585_v15 = vpop.f32.mrf.mxu2 }
 0x384   :  { %v588_v16 = vadd.f32 %v585_v15, %v377_v14 }
 0x386   :  { %v1648_v17 = vmul.f32 -1.442695, %v588_v16 }
 0x388   :  { %1708 = vpow2.f32 %v1648_v17 }
 0x389   :  { %v1707_v19 = vpop.eup %1706 }
 0x38a   :  { %v526_v20 = vadd.f32 1.0, %v1707_v19 }
 0x38c   :  { %1710 = vrcp.f32 %v526_v20  ;;  %v538_v24 = vand.u32 2147483648, %v526_v20  ;;  %v536_v27 = vand.u32 2147483647, %v526_v20  ;;  %vm532_vm10 = vweird.f32 %v526_v20 }
 0x38e   :  { %v1709_v22 = vpop.eup %1708  ;;  %v539_v30 = vor.u32 1.1754944e-38, %v538_v24  ;;  %vm537_vm12 = vcmp.eq.f32.partialorder %v536_v27, 8.507059e+37  ;;  %v2381_v27 = vpop.f32.mrf.mxu3 }
 0x38f   :  { %v592_v23 = vadd.f32 1.0, %v1709_v22 }
 0x391   :  { %1712 = vrcp.f32 %v592_v23  ;;  %v604_v37 = vand.u32 2147483648, %v592_v23  ;;  %v602_v40 = vand.u32 2147483647, %v592_v23  ;;  %vm598_vm14 = vweird.f32 %v592_v23 }
 0x392   :  { %v1711_v33 = vpop.eup %1710 }
 0x393   :  { %v528_v34 = vmul.f32 %v1711_v33, %v526_v20  ;;  %vm533_vm9 = vweird.f32 %v1711_v33  ;;  %v605_v46 = vor.u32 1.1754944e-38, %v604_v37  ;;  %vm603_vm1 = vcmp.eq.f32.partialorder %v602_v40, 8.507059e+37 }
 0x394   :  { %vm534_vm11 = vmor %vm532_vm10, %vm533_vm9 }
 0x395   :  { %v529_v35 = vsub.f32 1.0, %v528_v34 }
 0x397   :  { %v1713_v25 = vpop.eup %1712  ;;  %v530_v26 = vmul.f32 %v1711_v33, %v529_v35 }
 0x398   :  { %v594_v36 = vmul.f32 %v1713_v25, %v592_v23  ;;  %vm599_vm13 = vweird.f32 %v1713_v25 }
 0x399   :  { %v531_v28 = vadd.f32 %v1711_v33, %v530_v26  ;;  %vm600_vm15 = vmor %vm598_vm14, %vm599_vm13  ;;  %v380_v26 = vadd.f32 %v2207_v41, %v2209_v42 }
 0x39a   :  { %v595_v29 = vsub.f32 1.0, %v594_v36 }
 0x39b   :  { %v535_v31 = vsel %vm534_vm11, %v1711_v33, %v531_v28 }
 0x39c   :  { %v540_v38 = vsel %vm537_vm12, %v539_v30, %v535_v31  ;;  %v596_v39 = vmul.f32 %v1713_v25, %v595_v29 }
 0x39d   :  { %v542_v12 = vmul.f32 2.0, %v540_v38 }
 0x39e   :  { %v597_v43 = vadd.f32 %v1713_v25, %v596_v39 }
 0x39f   :  { %v1646_v44 = vadd.f32 -1.0, %v542_v12 }
 0x3a0   :  { %v601_v47 = vsel %vm600_vm15, %v1713_v25, %v597_v43 }
 0x3a1   :  { %v544_v56 = vsel %vm2223_vm7, %v1646_v44, %v540_v38  ;;  %v606_v57 = vsel %vm603_vm1, %v605_v46, %v601_v47 }
 0x3a2   :  { %551 = vrot.lane.b32.xlu2 %v544_v56, %s1804_s0  ;;  %v608_v60 = vmul.f32 2.0, %v606_v57  ;;  %v549_v13 = vmul.f32 %v547_v11, %v544_v56 }
 0x3a4   :  { %v1649_v61 = vadd.f32 -1.0, %v608_v60 }
 0x3a6   :  { %v610_v62 = vsel %vm2223_vm7, %v1649_v61, %v606_v57 }
 0x3a7   :  { %613 = vrot.lane.b32.xlu0 %v610_v62, %s1804_s0  ;;  %v611_v17 = vmul.f32 %v610_v62, %v2231_v45 }
 0x3fc   :  { %v552_v63 = vpop.permute.xlu2 %551 }
 0x3fd   :  { %v554_v4 = vmul.f32 %v552_v63, %v544_v56 }
 0x3ff   :  { %556 = vrot.lane.b32.xlu2 %v554_v4, %s1803_s21 }
 0x419   :  { %v614_v6 = vpop.permute.xlu0 %613 }
 0x41a   :  { %v616_v7 = vmul.f32 %v614_v6, %v610_v62 }
 0x41c   :  { %618 = vrot.lane.b32.xlu0 %v616_v7, %s1803_s21 }
 0x459   :  { %v557_v14 = vpop.permute.xlu2 %556 }
 0x45a   :  { %v2357_v15 = vadd.f32 %v557_v14, %v549_v13 }
 0x45c   :  { %1714 = vtanh.f32 %v2357_v15 }
 0x462   :  { %v1715_v16 = vpop.eup %1714 }
 0x463   :  { %562 = vrot.lane.b32.xlu1 %v1715_v16, %s1804_s0 }
 0x48e   :  { %v619_v19 = vpop.permute.xlu0 %618 }
 0x48f   :  { %v2362_v20 = vadd.f32 %v619_v19, %v611_v17 }
 0x491   :  { %1716 = vtanh.f32 %v2362_v20 }
 0x497   :  { %v1717_v22 = vpop.eup %1716 }
 0x498   :  { %624 = vrot.lane.b32.xlu2 %v1717_v22, %s1804_s0 }
 0x4d5   :  { %v563_v23 = vpop.permute.xlu1 %562 }
 0x4d6   :  { %v565_v33 = vmul.f32 %v563_v23, %v544_v56 }
 0x4d8   :  { %633 = vrot.lane.b32.xlu1 %v565_v33, %s1804_s0 }
 0x4f2   :  { %v625_v34 = vpop.permute.xlu2 %624 }
 0x4f3   :  { %v627_v35 = vmul.f32 %v625_v34, %v610_v62 }
 0x4f5   :  { %629 = vrot.lane.b32.xlu0 %v627_v35, %s1803_s21 }
 0x54a   :  { %v634_v24 = vpop.permute.xlu1 %633 }
 0x567   :  { %v630_v25 = vpop.permute.xlu0 %629 }
 0x568   :  { %v636_v45 = vsel %vm419_vm0, %v630_v25, %v634_v24  ;;  %1653 = vmatmul.msk.f32.vlgmr.msra.gmra.mxu0 %vm419_vm0, %v630_v25 }
 0x569   :  { %1650 = vmatmul.msk.f32.vlgmr.msrb.gmra.mxu3 %vm499_vm8, %v636_v45  ;;  %1112 = vmatpush.msra.mxu0 %v2079_v9 }
 0x56a   :  { %1245 = vmatpush.msrb.mxu3 %v2079_v9 }
 0x56b   :  { %1113 = vmatpush.msra.mxu0 %v2086_v10 }
 0x56c   :  { %1246 = vmatpush.msrb.mxu3 %v2086_v10 }
 0x56d   :  { %1114 = vmatpush.msra.mxu0 %v2112_v18 }
 0x56e   :  { %1247 = vmatpush.msrb.mxu3 %v2112_v18 }
 0x56f   :  { %1115 = vmatpush.msra.mxu0 %v2135_v21 }
 0x570   :  { %1248 = vmatpush.msrb.mxu3 %v2135_v21 }
 0x5e5   :  { %v718_v36 = vpop.f32.mrf.mxu0 }
 0x5e6   :  { %v721_v28 = vadd.f32 %v718_v36, %v380_v26 }
 0x5e8   :  { %v1654_v29 = vmul.f32 -1.442695, %v721_v28 }
 0x5ea   :  { %1718 = vpow2.f32 %v1654_v29 }
 0x5ec   :  { %v657_v30 = vpop.f32.mrf.mxu3 }
 0x5ed   :  { %v658_v31 = vadd.f32 %v2342_v3, %v657_v30 }
 0x5ef   :  { %v1651_v37 = vmul.f32 -1.442695, %v658_v31 }
 0x5f0   :  { %v1719_v38 = vpop.eup %1718 }
 0x5f1   :  { %v725_v39 = vadd.f32 1.0, %v1719_v38  ;;  %1720 = vpow2.f32 %v1651_v37 }
 0x5f3   :  { %1722 = vrcp.f32 %v725_v39  ;;  %v737_v42 = vand.u32 2147483648, %v725_v39  ;;  %v735_v47 = vand.u32 2147483647, %v725_v39  ;;  %vm731_vm3 = vweird.f32 %v725_v39 }
 0x5f5   :  { %v738_v61 = vor.u32 1.1754944e-38, %v737_v42  ;;  %vm736_vm5 = vcmp.eq.f32.partialorder %v735_v47, 8.507059e+37 }
 0x5f7   :  { %v1721_v40 = vpop.eup %1720 }
 0x5f8   :  { %v663_v12 = vadd.f32 1.0, %v1721_v40 }
 0x5f9   :  { %v1723_v43 = vpop.eup %1722 }
 0x5fa   :  { %v727_v44 = vmul.f32 %v1723_v43, %v725_v39  ;;  %1724 = vrcp.f32 %v663_v12  ;;  %vm732_vm2 = vweird.f32 %v1723_v43  ;;  %v675_v7 = vand.u32 2147483648, %v663_v12 }
 0x5fb   :  { %vm733_vm4 = vmor %vm731_vm3, %vm732_vm2  ;;  %v673_v13 = vand.u32 2147483647, %v663_v12  ;;  %vm669_vm9 = vweird.f32 %v663_v12 }
 0x5fc   :  { %v728_v41 = vsub.f32 1.0, %v727_v44  ;;  %v676_v19 = vor.u32 1.1754944e-38, %v675_v7 }
 0x5fd   :  { %vm674_vm11 = vcmp.eq.f32.partialorder %v673_v13, 8.507059e+37 }
 0x5fe   :  { %v729_v46 = vmul.f32 %v1723_v43, %v728_v41 }
 0x600   :  { %v1725_v56 = vpop.eup %1724  ;;  %v730_v57 = vadd.f32 %v1723_v43, %v729_v46 }
 0x601   :  { %v665_v60 = vmul.f32 %v1725_v56, %v663_v12  ;;  %vm670_vm6 = vweird.f32 %v1725_v56 }
 0x602   :  { %v734_v62 = vsel %vm733_vm4, %v1723_v43, %v730_v57  ;;  %vm671_vm10 = vmor %vm669_vm9, %vm670_vm6 }
 0x603   :  { %v666_v63 = vsub.f32 1.0, %v665_v60  ;;  %v739_v4 = vsel %vm736_vm5, %v738_v61, %v734_v62 }
 0x604   :  { %v741_v6 = vmul.f32 2.0, %v739_v4 }
 0x605   :  { %v667_v11 = vmul.f32 %v1725_v56, %v666_v63 }
 0x606   :  { %v1655_v14 = vadd.f32 -1.0, %v741_v6 }
 0x607   :  { %v668_v16 = vadd.f32 %v1725_v56, %v667_v11 }
 0x608   :  { %v743_v17 = vsel %vm2223_vm7, %v1655_v14, %v739_v4 }
 0x609   :  { %746 = vrot.lane.b32.xlu2 %v743_v17, %s1804_s0  ;;  %v672_v22 = vsel %vm671_vm10, %v1725_v56, %v668_v16  ;;  %v744_v36 = vmul.f32 %v743_v17, %v2362_v20 }
 0x60a   :  { %v677_v23 = vsel %vm674_vm11, %v676_v19, %v672_v22 }
 0x60b   :  { %v679_v33 = vmul.f32 2.0, %v677_v23 }
 0x60d   :  { %v1652_v34 = vadd.f32 -1.0, %v679_v33 }
 0x60f   :  { %v681_v35 = vsel %vm2223_vm7, %v1652_v34, %v677_v23 }
 0x610   :  { %684 = vrot.lane.b32.xlu0 %v681_v35, %s1804_s0  ;;  %v682_v30 = vmul.f32 %v681_v35, %v2357_v15 }
 0x663   :  { %v747_v24 = vpop.permute.xlu2 %746 }
 0x664   :  { %v749_v25 = vmul.f32 %v747_v24, %v743_v17 }
 0x666   :  { %751 = vrot.lane.b32.xlu1 %v749_v25, %s1803_s21 }
 0x682   :  { %v685_v45 = vpop.permute.xlu0 %684 }
 0x683   :  { %v687_v26 = vmul.f32 %v685_v45, %v681_v35 }
 0x685   :  { %689 = vrot.lane.b32.xlu2 %v687_v26, %s1803_s21 }
 0x6d8   :  { %v752_v28 = vpop.permute.xlu1 %751 }
 0x6d9   :  { %v2393_v29 = vadd.f32 %v752_v28, %v744_v36 }
 0x6db   :  { %1726 = vtanh.f32 %v2393_v29 }
 0x6df   :  { %v690_v31 = vpop.permute.xlu2 %689 }
 0x6e0   :  { %v2397_v37 = vadd.f32 %v690_v31, %v682_v30 }
 0x6e1   :  { %v1727_v38 = vpop.eup %1726 }
 0x6e2   :  { %1728 = vtanh.f32 %v2397_v37  ;;  %757 = vrot.lane.b32.xlu0 %v1727_v38, %s1804_s0 }
 0x6e8   :  { %v1729_v39 = vpop.eup %1728 }
 0x6e9   :  { %695 = vrot.lane.b32.xlu1 %v1729_v39, %s1804_s0 }
 0x754   :  { %v758_v40 = vpop.permute.xlu0 %757 }
 0x755   :  { %v760_v20 = vmul.f32 %v758_v40, %v743_v17 }
 0x757   :  { %762 = vrot.lane.b32.xlu2 %v760_v20, %s1803_s21 }
 0x75b   :  { %v696_v12 = vpop.permute.xlu1 %695 }
 0x75c   :  { %v698_v43 = vmul.f32 %v696_v12, %v681_v35 }
 0x75e   :  { %766 = vrot.lane.b32.xlu0 %v698_v43, %s1804_s0 }
 0x7b1   :  { %v763_v15 = vpop.permute.xlu2 %762 }
 0x7b2   :  { %1659 = vmatmul.msk.f32.vlgmr.msra.gmra.mxu2 %vm419_vm0, %v763_v15 }
 0x7b3   :  { %1378 = vmatpush.msra.mxu2 %v2079_v9 }
 0x7b5   :  { %1379 = vmatpush.msra.mxu2 %v2086_v10 }
 0x7b7   :  { %1380 = vmatpush.msra.mxu2 %v2112_v18 }
 0x7b9   :  { %1381 = vmatpush.msra.mxu2 %v2135_v21 }
 0x7d0   :  { %v767_v44 = vpop.permute.xlu0 %766 }
 0x7d1   :  { %v769_v41 = vsel %vm419_vm0, %v763_v15, %v767_v44 }
 0x7d2   :  { %1656 = vmatmul.msk.f32.vlgmr.msra.gmra.mxu1 %vm499_vm8, %v769_v41 }
 0x7d3   :  { %1522 = vmatpush.msra.mxu1 %v1500_v32 }
 0x835   :  { %v851_v42 = vpop.f32.mrf.mxu2 }
 0x836   :  { %v854_v46 = vadd.f32 %v851_v42, %v2211_v52 }
 0x838   :  { %v1660_v47 = vmul.f32 -1.442695, %v854_v46 }
 0x83a   :  { %1730 = vpow2.f32 %v1660_v47 }
 0x840   :  { %v1731_v56 = vpop.eup %1730 }
 0x841   :  { %v858_v57 = vadd.f32 1.0, %v1731_v56 }
 0x843   :  { %1732 = vrcp.f32 %v858_v57  ;;  %v870_v61 = vand.u32 2147483648, %v858_v57  ;;  %v868_v21 = vand.u32 2147483647, %v858_v57  ;;  %vm864_vm13 = vweird.f32 %v858_v57 }
 0x845   :  { %v871_v6 = vor.u32 1.1754944e-38, %v870_v61  ;;  %vm869_vm15 = vcmp.eq.f32.partialorder %v868_v21, 8.507059e+37 }
 0x849   :  { %v1733_v9 = vpop.eup %1732 }
 0x84a   :  { %v860_v60 = vmul.f32 %v1733_v9, %v858_v57  ;;  %vm865_vm12 = vweird.f32 %v1733_v9 }
 0x84b   :  { %vm866_vm14 = vmor %vm864_vm13, %vm865_vm12 }
 0x84c   :  { %v861_v10 = vsub.f32 1.0, %v860_v60 }
 0x84e   :  { %v862_v18 = vmul.f32 %v1733_v9, %v861_v10 }
 0x84f   :  { %v790_v62 = vpop.f32.mrf.mxu1 }
 0x850   :  { %v791_v63 = vadd.f32 %v2342_v3, %v790_v62  ;;  %v863_v4 = vadd.f32 %v1733_v9, %v862_v18 }
 0x852   :  { %v1657_v52 = vmul.f32 -1.442695, %v791_v63  ;;  %v867_v7 = vsel %vm866_vm14, %v1733_v9, %v863_v4 }
 0x853   :  { %v872_v11 = vsel %vm869_vm15, %v871_v6, %v867_v7 }
 0x854   :  { %1734 = vpow2.f32 %v1657_v52  ;;  %v874_v13 = vmul.f32 2.0, %v872_v11 }
 0x856   :  { %v1661_v14 = vadd.f32 -1.0, %v874_v13 }
 0x858   :  { %v876_v16 = vsel %vm2223_vm7, %v1661_v14, %v872_v11 }
 0x859   :  { %879 = vrot.lane.b32.xlu2 %v876_v16, %s1804_s0  ;;  %v877_v12 = vmul.f32 %v876_v16, %v2393_v29 }
 0x85a   :  { %v1735_v17 = vpop.eup %1734 }
 0x85b   :  { %v796_v19 = vadd.f32 1.0, %v1735_v17 }
 0x85d   :  { %1736 = vrcp.f32 %v796_v19  ;;  %v808_v34 = vand.u32 2147483648, %v796_v19  ;;  %v806_v24 = vand.u32 2147483647, %v796_v19  ;;  %vm802_vm2 = vweird.f32 %v796_v19 }
 0x85f   :  { %v809_v45 = vor.u32 1.1754944e-38, %v808_v34  ;;  %vm807_vm4 = vcmp.eq.f32.partialorder %v806_v24, 8.507059e+37 }
 0x863   :  { %v1737_v22 = vpop.eup %1736 }
 0x864   :  { %v798_v23 = vmul.f32 %v1737_v22, %v796_v19  ;;  %vm803_vm1 = vweird.f32 %v1737_v22 }
 0x865   :  { %vm804_vm3 = vmor %vm802_vm2, %vm803_vm1 }
 0x866   :  { %v799_v33 = vsub.f32 1.0, %v798_v23 }
 0x868   :  { %v800_v35 = vmul.f32 %v1737_v22, %v799_v33 }
 0x86a   :  { %v801_v25 = vadd.f32 %v1737_v22, %v800_v35 }
 0x86c   :  { %v805_v26 = vsel %vm804_vm3, %v1737_v22, %v801_v25 }
 0x86d   :  { %v810_v36 = vsel %vm807_vm4, %v809_v45, %v805_v26 }
 0x86e   :  { %v812_v28 = vmul.f32 2.0, %v810_v36 }
 0x870   :  { %v1658_v30 = vadd.f32 -1.0, %v812_v28 }
 0x872   :  { %v814_v31 = vsel %vm2223_vm7, %v1658_v30, %v810_v36 }
 0x873   :  { %817 = vrot.lane.b32.xlu1 %v814_v31, %s1804_s0  ;;  %v815_v41 = vmul.f32 %v814_v31, %v2397_v37 }
 0x8b3   :  { %v880_v38 = vpop.permute.xlu2 %879 }
 0x8b4   :  { %v882_v39 = vmul.f32 %v880_v38, %v876_v16 }
 0x8b6   :  { %884 = vrot.lane.b32.xlu1 %v882_v39, %s1803_s21 }
 0x8e5   :  { %v818_v40 = vpop.permute.xlu1 %817 }
 0x8e6   :  { %v820_v20 = vmul.f32 %v818_v40, %v814_v31 }
 0x8e8   :  { %822 = vrot.lane.b32.xlu0 %v820_v20, %s1803_s21 }
 0x928   :  { %v885_v43 = vpop.permute.xlu1 %884 }
 0x929   :  { %v2422_v15 = vadd.f32 %v885_v43, %v877_v12 }
 0x92b   :  { %1738 = vtanh.f32 %v2422_v15 }
 0x931   :  { %v1739_v44 = vpop.eup %1738 }
 0x932   :  { %890 = vrot.lane.b32.xlu0 %v1739_v44, %s1804_s0 }
 0x95a   :  { %v823_v42 = vpop.permute.xlu0 %822 }
 0x95b   :  { %v2427_v46 = vadd.f32 %v823_v42, %v815_v41 }
 0x95d   :  { %1740 = vtanh.f32 %v2427_v46 }
 0x963   :  { %v1741_v47 = vpop.eup %1740 }
 0x964   :  { %828 = vrot.lane.b32.xlu2 %v1741_v47, %s1804_s0 }
 0x9a4   :  { %v891_v56 = vpop.permute.xlu0 %890 }
 0x9a5   :  { %v893_v29 = vmul.f32 %v891_v56, %v876_v16 }
 0x9a7   :  { %895 = vrot.lane.b32.xlu1 %v893_v29, %s1803_s21 }
 0x9be   :  { %v829_v57 = vpop.permute.xlu2 %828 }
 0x9bf   :  { %v831_v9 = vmul.f32 %v829_v57, %v814_v31 }
 0x9c1   :  { %899 = vrot.lane.b32.xlu2 %v831_v9, %s1804_s0 }
 0xa19   :  { %v896_v60 = vpop.permute.xlu1 %895 }
 0xa1a   :  { %1665 = vmatmul.msk.f32.vlgmr.msrb.gmra.mxu0 %vm419_vm0, %v896_v60 }
 0xa1b   :  { %v900_v37 = vpop.permute.xlu2 %899  ;;  %1313 = vmatpush.msrb.mxu0 %v2242_v48 }
 0xa1c   :  { %v902_v10 = vsel %vm419_vm0, %v896_v60, %v900_v37 }
 0xa1d   :  { %1662 = vmatmul.msk.f32.vlgmr.msra.gmra.mxu3 %vm499_vm8, %v902_v10  ;;  %1314 = vmatpush.msrb.mxu0 %v2247_v49 }
 0xa1e   :  { %1446 = vmatpush.msra.mxu3 %v2242_v48 }
 0xa1f   :  { %1315 = vmatpush.msrb.mxu0 %v2254_v50 }
 0xa20   :  { %1447 = vmatpush.msra.mxu3 %v2247_v49 }
 0xa21   :  { %1316 = vmatpush.msrb.mxu0 %v2261_v51 }
 0xa22   :  { %1448 = vmatpush.msra.mxu3 %v2254_v50 }
 0xa23   :  { %1317 = vmatpush.msrb.mxu0 %v2268_v53 }
 0xa24   :  { %1449 = vmatpush.msra.mxu3 %v2261_v51 }
 0xa25   :  { %1318 = vmatpush.msrb.mxu0 %v2275_v54 }
 0xa26   :  { %1450 = vmatpush.msra.mxu3 %v2268_v53 }
 0xa27   :  { %1319 = vmatpush.msrb.mxu0 %v2282_v55 }
 0xa28   :  { %1451 = vmatpush.msra.mxu3 %v2275_v54 }
 0xa29   :  { %1320 = vmatpush.msrb.mxu0 %v2292_v58 }
 0xa2a   :  { %1452 = vmatpush.msra.mxu3 %v2282_v55 }
 0xa2c   :  { %1453 = vmatpush.msra.mxu3 %v2292_v58 }
 0xa97   :  { %v984_v48 = vpop.f32.mrf.mxu0 }
 0xa98   :  { %v987_v49 = vadd.f32 %v984_v48, %v2213_v59 }
 0xa9a   :  { %v1666_v50 = vmul.f32 -1.442695, %v987_v49 }
 0xa9c   :  { %1742 = vpow2.f32 %v1666_v50 }
 0xaa0   :  { %v923_v51 = vpop.f32.mrf.mxu3 }
 0xaa1   :  { %v924_v61 = vadd.f32 %v2342_v3, %v923_v51 }
 0xaa2   :  { %v1743_v18 = vpop.eup %1742 }
 0xaa3   :  { %v991_v53 = vadd.f32 1.0, %v1743_v18  ;;  %v1663_v21 = vmul.f32 -1.442695, %v924_v61 }
 0xaa5   :  { %1744 = vrcp.f32 %v991_v53  ;;  %v1003_v58 = vand.u32 2147483648, %v991_v53  ;;  %v1001_v59 = vand.u32 2147483647, %v991_v53  ;;  %vm997_vm6 = vweird.f32 %v991_v53 }
 0xaa6   :  { %1746 = vpow2.f32 %v1663_v21 }
 0xaa7   :  { %v1004_v7 = vor.u32 1.1754944e-38, %v1003_v58  ;;  %vm1002_vm10 = vcmp.eq.f32.partialorder %v1001_v59, 8.507059e+37 }
 0xaab   :  { %v1745_v54 = vpop.eup %1744 }
 0xaac   :  { %v1747_v62 = vpop.eup %1746  ;;  %v993_v63 = vmul.f32 %v1745_v54, %v991_v53  ;;  %vm998_vm5 = vweird.f32 %v1745_v54 }
 0xaad   :  { %v929_v4 = vadd.f32 1.0, %v1747_v62  ;;  %vm999_vm9 = vmor %vm997_vm6, %vm998_vm5 }
 0xaae   :  { %v994_v55 = vsub.f32 1.0, %v993_v63 }
 0xaaf   :  { %1748 = vrcp.f32 %v929_v4  ;;  %v941_v23 = vand.u32 2147483648, %v929_v4  ;;  %v939_v35 = vand.u32 2147483647, %v929_v4  ;;  %vm935_vm12 = vweird.f32 %v929_v4 }
 0xab0   :  { %v995_v6 = vmul.f32 %v1745_v54, %v994_v55 }
 0xab1   :  { %v942_v25 = vor.u32 1.1754944e-38, %v941_v23  ;;  %vm940_vm14 = vcmp.eq.f32.partialorder %v939_v35, 8.507059e+37 }
 0xab2   :  { %v996_v52 = vadd.f32 %v1745_v54, %v995_v6 }
 0xab4   :  { %v1000_v11 = vsel %vm999_vm9, %v1745_v54, %v996_v52 }
 0xab5   :  { %v1749_v13 = vpop.eup %1748  ;;  %v1005_v14 = vsel %vm1002_vm10, %v1004_v7, %v1000_v11 }
 0xab6   :  { %v931_v16 = vmul.f32 %v1749_v13, %v929_v4  ;;  %v1007_v17 = vmul.f32 2.0, %v1005_v14  ;;  %vm936_vm11 = vweird.f32 %v1749_v13 }
 0xab7   :  { %vm937_vm13 = vmor %vm935_vm12, %vm936_vm11 }
 0xab8   :  { %v932_v19 = vsub.f32 1.0, %v931_v16  ;;  %v1667_v22 = vadd.f32 -1.0, %v1007_v17 }
 0xaba   :  { %v1009_v33 = vsel %vm2223_vm7, %v1667_v22, %v1005_v14  ;;  %v933_v34 = vmul.f32 %v1749_v13, %v932_v19 }
 0xabb   :  { %1012 = vrot.lane.b32.xlu0 %v1009_v33, %s1804_s0  ;;  %v1010_v20 = vmul.f32 %v1009_v33, %v2422_v15 }
 0xabc   :  { %v934_v24 = vadd.f32 %v1749_v13, %v933_v34 }
 0xabe   :  { %v938_v45 = vsel %vm937_vm13, %v1749_v13, %v934_v24 }
 0xabf   :  { %v943_v26 = vsel %vm940_vm14, %v942_v25, %v938_v45 }
 0xac0   :  { %v945_v36 = vmul.f32 2.0, %v943_v26 }
 0xac2   :  { %v1664_v28 = vadd.f32 -1.0, %v945_v36 }
 0xac4   :  { %v947_v30 = vsel %vm2223_vm7, %v1664_v28, %v943_v26 }
 0xac5   :  { %950 = vrot.lane.b32.xlu1 %v947_v30, %s1804_s0  ;;  %v948_v41 = vmul.f32 %v947_v30, %v2427_v46 }
 0xb2d   :  { %v1013_v31 = vpop.permute.xlu0 %1012 }
 0xb2e   :  { %v1015_v38 = vmul.f32 %v1013_v31, %v1009_v33 }
 0xb30   :  { %1017 = vrot.lane.b32.xlu2 %v1015_v38, %s1803_s21 }
 0xb37   :  { %v951_v39 = vpop.permute.xlu1 %950 }
 0xb38   :  { %v953_v40 = vmul.f32 %v951_v39, %v947_v30 }
 0xb3a   :  { %955 = vrot.lane.b32.xlu0 %v953_v40, %s1803_s21 }
 0xb8a   :  { %v1018_v12 = vpop.permute.xlu2 %1017 }
 0xb8b   :  { %v2463_v43 = vadd.f32 %v1018_v12, %v1010_v20 }
 0xb8d   :  { %1750 = vtanh.f32 %v2463_v43 }
 0xb93   :  { %v1751_v44 = vpop.eup %1750 }
 0xb94   :  { %1023 = vrot.lane.b32.xlu1 %v1751_v44, %s1804_s0 }
 0xbac   :  { %v956_v42 = vpop.permute.xlu0 %955 }
 0xbad   :  { %v2468_v47 = vadd.f32 %v956_v42, %v948_v41 }
 0xbaf   :  { %1752 = vtanh.f32 %v2468_v47 }
 0xbb5   :  { %v1753_v56 = vpop.eup %1752 }
 0xbb6   :  { %961 = vrot.lane.b32.xlu2 %v1753_v56, %s1804_s0 }
 0xc06   :  { %v1024_v29 = vpop.permute.xlu1 %1023 }
 0xc07   :  { %v1026_v15 = vmul.f32 %v1024_v29, %v1009_v33 }
 0xc09   :  { %1028 = vrot.lane.b32.xlu0 %v1026_v15, %s1803_s21 }
 0xc10   :  { %v962_v57 = vpop.permute.xlu2 %961 }
 0xc11   :  { %v964_v9 = vmul.f32 %v962_v57, %v947_v30 }
 0xc13   :  { %1032 = vrot.lane.b32.xlu1 %v964_v9, %s1804_s0 }
 0xc7b   :  { %v1029_v60 = vpop.permute.xlu0 %1028 }
 0xc7c   :  { %1671 = vmatmul.msk.f32.vlgmr.msra.gmra.mxu0 %vm419_vm0, %v1029_v60 }
 0xc85   :  { %v1033_v46 = vpop.permute.xlu1 %1032 }
 0xc86   :  { %v1035_v37 = vsel %vm419_vm0, %v1029_v60, %v1033_v46 }
 0xc87   :  { %1668 = vmatmul.msk.f32.vlgmr.msrb.gmra.mxu2 %vm499_vm8, %v1035_v37 }
 0xcf9   :  { %v1117_v10 = vpop.f32.mrf.mxu0 }
 0xcfa   :  { %v1120_v48 = vadd.f32 %v1117_v10, %v2215_v2 }
 0xcfc   :  { %v1672_v49 = vmul.f32 -1.442695, %v1120_v48 }
 0xcfe   :  { %1754 = vpow2.f32 %v1672_v49 }
 0xd04   :  { %v1755_v50 = vpop.eup %1754 }
 0xd05   :  { %v1124_v51 = vadd.f32 1.0, %v1755_v50 }
 0xd07   :  { %1756 = vrcp.f32 %v1124_v51  ;;  %v1136_v63 = vand.u32 2147483648, %v1124_v51  ;;  %v1134_v55 = vand.u32 2147483647, %v1124_v51  ;;  %vm1130_vm1 = vweird.f32 %v1124_v51 }
 0xd09   :  { %v1137_v6 = vor.u32 1.1754944e-38, %v1136_v63  ;;  %vm1135_vm3 = vcmp.eq.f32.partialorder %v1134_v55, 8.507059e+37 }
 0xd0a   :  { %v1056_v61 = vpop.f32.mrf.mxu2 }
 0xd0b   :  { %v1057_v18 = vadd.f32 %v2342_v3, %v1056_v61 }
 0xd0d   :  { %v1757_v53 = vpop.eup %1756  ;;  %v1669_v21 = vmul.f32 -1.442695, %v1057_v18 }
 0xd0e   :  { %v1126_v54 = vmul.f32 %v1757_v53, %v1124_v51  ;;  %vm1131_vm15 = vweird.f32 %v1757_v53 }
 0xd0f   :  { %1758 = vpow2.f32 %v1669_v21  ;;  %vm1132_vm2 = vmor %vm1130_vm1, %vm1131_vm15 }
 0xd10   :  { %v1127_v62 = vsub.f32 1.0, %v1126_v54 }
 0xd12   :  { %v1128_v4 = vmul.f32 %v1757_v53, %v1127_v62 }
 0xd14   :  { %v1129_v58 = vadd.f32 %v1757_v53, %v1128_v4 }
 0xd15   :  { %v1759_v2 = vpop.eup %1758 }
 0xd16   :  { %v1062_v59 = vadd.f32 1.0, %v1759_v2  ;;  %v1133_v52 = vsel %vm1132_vm2, %v1757_v53, %v1129_v58 }
 0xd17   :  { %v1138_v7 = vsel %vm1135_vm3, %v1137_v6, %v1133_v52 }
 0xd18   :  { %1760 = vrcp.f32 %v1062_v59  ;;  %v1140_v11 = vmul.f32 2.0, %v1138_v7  ;;  %v1074_v22 = vand.u32 2147483648, %v1062_v59  ;;  %v1072_v33 = vand.u32 2147483647, %v1062_v59 }
 0xd19   :  { %vm1068_vm5 = vweird.f32 %v1062_v59 }
 0xd1a   :  { %v1673_v13 = vadd.f32 -1.0, %v1140_v11  ;;  %v1075_v35 = vor.u32 1.1754944e-38, %v1074_v22  ;;  %vm1073_vm9 = vcmp.eq.f32.partialorder %v1072_v33, 8.507059e+37 }
 0xd1c   :  { %v1142_v14 = vsel %vm2223_vm7, %v1673_v13, %v1138_v7 }
 0xd1d   :  { %1145 = vrot.lane.b32.xlu2 %v1142_v14, %s1804_s0  ;;  %v1143_v39 = vmul.f32 %v1142_v14, %v2463_v43 }
 0xd1e   :  { %v1761_v16 = vpop.eup %1760 }
 0xd1f   :  { %v1064_v17 = vmul.f32 %v1761_v16, %v1062_v59  ;;  %vm1069_vm4 = vweird.f32 %v1761_v16 }
 0xd20   :  { %vm1070_vm6 = vmor %vm1068_vm5, %vm1069_vm4 }
 0xd21   :  { %v1065_v19 = vsub.f32 1.0, %v1064_v17 }
 0xd23   :  { %v1066_v23 = vmul.f32 %v1761_v16, %v1065_v19 }
 0xd25   :  { %v1067_v34 = vadd.f32 %v1761_v16, %v1066_v23 }
 0xd27   :  { %v1071_v24 = vsel %vm1070_vm6, %v1761_v16, %v1067_v34 }
 0xd28   :  { %v1076_v25 = vsel %vm1073_vm9, %v1075_v35, %v1071_v24 }
 0xd29   :  { %v1078_v45 = vmul.f32 2.0, %v1076_v25 }
 0xd2b   :  { %v1670_v26 = vadd.f32 -1.0, %v1078_v45 }
 0xd2d   :  { %v1080_v36 = vsel %vm2223_vm7, %v1670_v26, %v1076_v25 }
 0xd2e   :  { %1083 = vrot.lane.b32.xlu0 %v1080_v36, %s1804_s0  ;;  %v1081_v44 = vmul.f32 %v1080_v36, %v2468_v47 }
 0xd77   :  { %v1146_v28 = vpop.permute.xlu2 %1145 }
 0xd78   :  { %v1148_v30 = vmul.f32 %v1146_v28, %v1142_v14 }
 0xd7a   :  { %1150 = vrot.lane.b32.xlu1 %v1148_v30, %s1803_s21 }
 0xda0   :  { %v1084_v31 = vpop.permute.xlu0 %1083 }
 0xda1   :  { %v1086_v38 = vmul.f32 %v1084_v31, %v1080_v36 }
 0xda3   :  { %1088 = vrot.lane.b32.xlu2 %v1086_v38, %s1803_s21 }
 0xdec   :  { %v1151_v40 = vpop.permute.xlu1 %1150 }
 0xded   :  { %v2488_v20 = vadd.f32 %v1151_v40, %v1143_v39 }
 0xdef   :  { %1762 = vtanh.f32 %v2488_v20 }
 0xdf5   :  { %v1763_v12 = vpop.eup %1762 }
 0xdf6   :  { %1156 = vrot.lane.b32.xlu0 %v1763_v12, %s1804_s0 }
 0xdfd   :  { %v1089_v41 = vpop.permute.xlu2 %1088 }
 0xdfe   :  { %v2493_v42 = vadd.f32 %v1089_v41, %v1081_v44 }
 0xe00   :  { %1764 = vtanh.f32 %v2493_v42 }
 0xe06   :  { %v1765_v56 = vpop.eup %1764 }
 0xe07   :  { %1094 = vrot.lane.b32.xlu1 %v1765_v56, %s1804_s0 }
 0xe68   :  { %v1157_v29 = vpop.permute.xlu0 %1156 }
 0xe69   :  { %v1159_v43 = vmul.f32 %v1157_v29, %v1142_v14 }
 0xe6b   :  { %1161 = vrot.lane.b32.xlu2 %v1159_v43, %s1803_s21 }
 0xe79   :  { %v1095_v15 = vpop.permute.xlu1 %1094 }
 0xe7a   :  { %v1097_v57 = vmul.f32 %v1095_v15, %v1080_v36 }
 0xe7c   :  { %1165 = vrot.lane.b32.xlu0 %v1097_v57, %s1804_s0  ;;  %v313_v57 = vadd.f32 %v2335_v0, %v2217_v5 }
 0xec5   :  { %v1162_v9 = vpop.permute.xlu2 %1161 }
 0xec6   :  { %1677 = vmatmul.msk.f32.vlgmr.msrb.gmra.mxu3 %vm419_vm0, %v1162_v9 }
 0xeee   :  { %v1166_v47 = vpop.permute.xlu0 %1165 }
 0xeef   :  { %v1168_v60 = vsel %vm419_vm0, %v1162_v9, %v1166_v47  ;;  %v354_v9 = vadd.f32 %v2337_v1, %v313_v57 }
 0xef0   :  { %1674 = vmatmul.msk.f32.vlgmr.msrb.gmra.mxu1 %vm499_vm8, %v1168_v60 }
 0xef1   :  { %v395_v47 = vadd.f32 %v2381_v27, %v354_v9 }
 0xf49   :  { %v1250_v46 = vpop.f32.mrf.mxu3 }
 0xf4a   :  { %v1253_v37 = vadd.f32 %v1250_v46, %v2219_v8 }
 0xf4c   :  { %v1678_v10 = vmul.f32 -1.442695, %v1253_v37 }
 0xf4e   :  { %1766 = vpow2.f32 %v1678_v10 }
 0xf54   :  { %v1767_v48 = vpop.eup %1766 }
 0xf55   :  { %v1257_v49 = vadd.f32 1.0, %v1767_v48  ;;  %v2534_v48 = vld [vmem:[%s2597_s6] ss:$0 sm:$0xff] }
 0xf57   :  { %1768 = vrcp.f32 %v1257_v49  ;;  %v1269_v18 = vand.u32 2147483648, %v1257_v49  ;;  %v1267_v21 = vand.u32 2147483647, %v1257_v49  ;;  %vm1263_vm11 = vweird.f32 %v1257_v49 }
 0xf59   :  { %v1270_v62 = vor.u32 1.1754944e-38, %v1269_v18  ;;  %vm1268_vm13 = vcmp.eq.f32.partialorder %v1267_v21, 8.507059e+37 }
 0xf5d   :  { %v1769_v50 = vpop.eup %1768 }
 0xf5e   :  { %v1259_v51 = vmul.f32 %v1769_v50, %v1257_v49  ;;  %vm1264_vm10 = vweird.f32 %v1769_v50 }
 0xf5f   :  { %vm1265_vm12 = vmor %vm1263_vm11, %vm1264_vm10 }
 0xf60   :  { %v1260_v61 = vsub.f32 1.0, %v1259_v51 }
 0xf62   :  { %v1261_v53 = vmul.f32 %v1769_v50, %v1260_v61 }
 0xf64   :  { %v1262_v54 = vadd.f32 %v1769_v50, %v1261_v53 }
 0xf66   :  { %v1266_v63 = vsel %vm1265_vm12, %v1769_v50, %v1262_v54 }
 0xf67   :  { %v1271_v4 = vsel %vm1268_vm13, %v1270_v62, %v1266_v63 }
 0xf68   :  { %v1273_v8 = vmul.f32 2.0, %v1271_v4 }
 0xf6a   :  { %v1679_v55 = vadd.f32 -1.0, %v1273_v8 }
 0xf6c   :  { %v1275_v58 = vsel %vm2223_vm7, %v1679_v55, %v1271_v4 }
 0xf6d   :  { %v1189_v2 = vpop.f32.mrf.mxu1  ;;  %1278 = vrot.lane.b32.xlu1 %v1275_v58, %s1804_s0  ;;  %v1276_v28 = vmul.f32 %v1275_v58, %v2488_v20 }
 0xf6e   :  { %v1190_v6 = vadd.f32 %v2342_v3, %v1189_v2 }
 0xf70   :  { %v1675_v59 = vmul.f32 -1.442695, %v1190_v6 }
 0xf72   :  { %1770 = vpow2.f32 %v1675_v59 }
 0xf78   :  { %v1771_v52 = vpop.eup %1770 }
 0xf79   :  { %v1195_v7 = vadd.f32 1.0, %v1771_v52 }
 0xf7b   :  { %1772 = vrcp.f32 %v1195_v7  ;;  %v1207_v16 = vand.u32 2147483648, %v1195_v7  ;;  %v1205_v19 = vand.u32 2147483647, %v1195_v7  ;;  %vm1201_vm15 = vweird.f32 %v1195_v7 }
 0xf7d   :  { %v1208_v23 = vor.u32 1.1754944e-38, %v1207_v16  ;;  %vm1206_vm2 = vcmp.eq.f32.partialorder %v1205_v19, 8.507059e+37 }
 0xf81   :  { %v1773_v11 = vpop.eup %1772 }
 0xf82   :  { %v1197_v13 = vmul.f32 %v1773_v11, %v1195_v7  ;;  %vm1202_vm14 = vweird.f32 %v1773_v11 }
 0xf83   :  { %vm1203_vm1 = vmor %vm1201_vm15, %vm1202_vm14 }
 0xf84   :  { %v1198_v14 = vsub.f32 1.0, %v1197_v13 }
 0xf86   :  { %v1199_v17 = vmul.f32 %v1773_v11, %v1198_v14 }
 0xf88   :  { %v1200_v22 = vadd.f32 %v1773_v11, %v1199_v17 }
 0xf8a   :  { %v1204_v33 = vsel %vm1203_vm1, %v1773_v11, %v1200_v22 }
 0xf8b   :  { %v1209_v34 = vsel %vm1206_vm2, %v1208_v23, %v1204_v33 }
 0xf8c   :  { %v1211_v3 = vmul.f32 2.0, %v1209_v34 }
 0xf8e   :  { %v1676_v35 = vadd.f32 -1.0, %v1211_v3 }
 0xf90   :  { %v1213_v24 = vsel %vm2223_vm7, %v1676_v35, %v1209_v34 }
 0xf91   :  { %1216 = vrot.lane.b32.xlu2 %v1213_v24, %s1804_s0  ;;  %v1214_v39 = vmul.f32 %v1213_v24, %v2493_v42 }
 0xfdf   :  { %v1279_v25 = vpop.permute.xlu1 %1278 }
 0xfe0   :  { %v1281_v45 = vmul.f32 %v1279_v25, %v1275_v58 }
 0xfe2   :  { %1283 = vrot.lane.b32.xlu0 %v1281_v45, %s1803_s21 }
 0xfeb   :  { %v1217_v26 = vpop.permute.xlu2 %1216 }
 0xfec   :  { %v1219_v36 = vmul.f32 %v1217_v26, %v1213_v24 }
 0xfee   :  { %1221 = vrot.lane.b32.xlu1 %v1219_v36, %s1803_s21 }
0x1054   :  { %v1284_v30 = vpop.permute.xlu0 %1283 }
0x1055   :  { %v2513_v31 = vadd.f32 %v1284_v30, %v1276_v28 }
0x1057   :  { %1774 = vtanh.f32 %v2513_v31 }
0x105d   :  { %v1775_v38 = vpop.eup %1774 }
0x105e   :  { %1289 = vrot.lane.b32.xlu2 %v1775_v38, %s1804_s0 }
0x1060   :  { %v1222_v40 = vpop.permute.xlu1 %1221 }
0x1061   :  { %v2518_v12 = vadd.f32 %v1222_v40, %v1214_v39 }
0x1063   :  { %1776 = vtanh.f32 %v2518_v12 }
0x1069   :  { %v1777_v44 = vpop.eup %1776 }
0x106a   :  { %1227 = vrot.lane.b32.xlu0 %v1777_v44, %s1804_s0 }
0x10b8   :  { %v1290_v41 = vpop.permute.xlu2 %1289 }
0x10b9   :  { %v1292_v20 = vmul.f32 %v1290_v41, %v1275_v58 }
0x10bb   :  { %1294 = vrot.lane.b32.xlu1 %v1292_v20, %s1803_s21 }
0x10dc   :  { %v1228_v56 = vpop.permute.xlu0 %1227 }
0x10dd   :  { %v1230_v29 = vmul.f32 %v1228_v56, %v1213_v24 }
0x10df   :  { %1298 = vrot.lane.b32.xlu2 %v1230_v29, %s1804_s0 }
0x112d   :  { %v1295_v43 = vpop.permute.xlu1 %1294 }
0x112e   :  { %1683 = vmatmul.msk.f32.vlgmr.msra.gmra.mxu2 %vm419_vm0, %v1295_v43 }
0x1139   :  { %v1299_v42 = vpop.permute.xlu2 %1298 }
0x113a   :  { %v1301_v15 = vsel %vm419_vm0, %v1295_v43, %v1299_v42 }
0x113b   :  { %1680 = vmatmul.msk.f32.vlgmr.msrb.gmra.mxu0 %vm499_vm8, %v1301_v15 }
0x11b1   :  { %v1383_v60 = vpop.f32.mrf.mxu2 }
0x11b2   :  { %v1386_v46 = vadd.f32 %v1383_v60, %v395_v47 }
0x11b4   :  { %v1684_v37 = vmul.f32 -1.442695, %v1386_v46 }
0x11b6   :  { %1778 = vpow2.f32 %v1684_v37 }
0x11b8   :  { %v1322_v10 = vpop.f32.mrf.mxu0 }
0x11b9   :  { %v1323_v49 = vadd.f32 %v2534_v48, %v1322_v10 }
0x11bb   :  { %v1681_v50 = vmul.f32 -1.442695, %v1323_v49 }
0x11bc   :  { %v1779_v51 = vpop.eup %1778 }
0x11bd   :  { %v1390_v61 = vadd.f32 1.0, %v1779_v51  ;;  %1780 = vpow2.f32 %v1681_v50 }
0x11bf   :  { %1782 = vrcp.f32 %v1390_v61  ;;  %v1402_v53 = vand.u32 2147483648, %v1390_v61  ;;  %v1400_v54 = vand.u32 2147483647, %v1390_v61  ;;  %vm1396_vm4 = vweird.f32 %v1390_v61 }
0x11c1   :  { %v1403_v8 = vor.u32 1.1754944e-38, %v1402_v53  ;;  %vm1401_vm6 = vcmp.eq.f32.partialorder %v1400_v54, 8.507059e+37 }
0x11c3   :  { %v1781_v5 = vpop.eup %1780 }
0x11c4   :  { %v1328_v0 = vadd.f32 1.0, %v1781_v5 }
0x11c5   :  { %v1783_v1 = vpop.eup %1782 }
0x11c6   :  { %v1392_v27 = vmul.f32 %v1783_v1, %v1390_v61  ;;  %1784 = vrcp.f32 %v1328_v0  ;;  %vm1397_vm3 = vweird.f32 %v1783_v1  ;;  %v1340_v59 = vand.u32 2147483648, %v1328_v0 }
0x11c7   :  { %vm1398_vm5 = vmor %vm1396_vm4, %vm1397_vm3  ;;  %v1338_v7 = vand.u32 2147483647, %v1328_v0  ;;  %vm1334_vm10 = vweird.f32 %v1328_v0  ;;  %vm1549_vm3 = vcmask 7168  }
0x11c8   :  { %v1393_v18 = vsub.f32 1.0, %v1392_v27  ;;  %v1341_v16 = vor.u32 1.1754944e-38, %v1340_v59 }
0x11c9   :  { %vm1339_vm12 = vcmp.eq.f32.partialorder %v1338_v7, 8.507059e+37 }
0x11ca   :  { %v1394_v21 = vmul.f32 %v1783_v1, %v1393_v18 }
0x11cc   :  { %v1785_v62 = vpop.eup %1784  ;;  %v1395_v63 = vadd.f32 %v1783_v1, %v1394_v21 }
0x11cd   :  { %v1330_v4 = vmul.f32 %v1785_v62, %v1328_v0  ;;  %vm1335_vm9 = vweird.f32 %v1785_v62 }
0x11ce   :  { %v1399_v55 = vsel %vm1398_vm5, %v1783_v1, %v1395_v63  ;;  %vm1336_vm11 = vmor %vm1334_vm10, %vm1335_vm9  ;;  %v1498_v63 = vld [vmem:[%s2598_s7 + $0x8] sm:$0xff] }
0x11cf   :  { %v1331_v58 = vsub.f32 1.0, %v1330_v4  ;;  %v1404_v2 = vsel %vm1401_vm6, %v1403_v8, %v1399_v55  ;;  %v1497_v4 = vld [vmem:[%s2598_s7] sm:$0xff] }
0x11d0   :  { %v1406_v6 = vmul.f32 2.0, %v1404_v2 }
0x11d1   :  { %v1332_v52 = vmul.f32 %v1785_v62, %v1331_v58  ;;  %v16_v58 = vstv %s2599_s8 }
0x11d2   :  { %v1685_v11 = vadd.f32 -1.0, %v1406_v6  ;;  %17 = vst [vmem:[#allocation2] sm:$0x1] %v16_v58 }
0x11d3   :  { %v1333_v13 = vadd.f32 %v1785_v62, %v1332_v52 }
0x11d4   :  { %v1408_v14 = vsel %vm2223_vm7, %v1685_v11, %v1404_v2 }
0x11d5   :  { %1411 = vrot.lane.b32.xlu1 %v1408_v14, %s1804_s0  ;;  %v1337_v17 = vsel %vm1336_vm11, %v1785_v62, %v1333_v13  ;;  %v1409_v28 = vmul.f32 %v1408_v14, %v2513_v31  ;;  %v1499_v62 = vld [vmem:[%s2598_s7 + $0x10] sm:$0xff] }
0x11d6   :  { %v1342_v19 = vsel %vm1339_vm12, %v1341_v16, %v1337_v17  ;;  %1523 = vmatpush.msra.mxu1 %v1499_v62 }
0x11d7   :  { %v1344_v22 = vmul.f32 2.0, %v1342_v19 }
0x11d8   :  { %1524 = vmatpush.msra.mxu1 %v1498_v63 }
0x11d9   :  { %v1682_v23 = vadd.f32 -1.0, %v1344_v22 }
0x11da   :  { %1525 = vmatpush.msra.mxu1 %v1497_v4 }
0x11db   :  { %v1346_v33 = vsel %vm2223_vm7, %v1682_v23, %v1342_v19 }
0x11dc   :  { %1349 = vrot.lane.b32.xlu0 %v1346_v33, %s1804_s0  ;;  %v1347_v25 = vmul.f32 %v1346_v33, %v2518_v12 }
0x1247   :  { %v1412_v34 = vpop.permute.xlu1 %1411 }
0x1248   :  { %v1414_v3 = vmul.f32 %v1412_v34, %v1408_v14 }
0x124a   :  { %1416 = vrot.lane.b32.xlu0 %v1414_v3, %s1803_s21 }
0x124e   :  { %v1350_v35 = vpop.permute.xlu0 %1349 }
0x124f   :  { %v1352_v24 = vmul.f32 %v1350_v35, %v1346_v33 }
0x1251   :  { %1354 = vrot.lane.b32.xlu2 %v1352_v24, %s1803_s21 }
0x12ab   :  { %v1355_v45 = vpop.permute.xlu2 %1354 }
0x12ac   :  { %v1357_v26 = vadd.f32 %v1355_v45, %v1347_v25 }
0x12ae   :  { %1786 = vtanh.f32 %v1357_v26 }
0x12b4   :  { %v1787_v36 = vpop.eup %1786 }
0x12b5   :  { %1360 = vrot.lane.b32.xlu1 %v1787_v36, %s1804_s0 }
0x12bc   :  { %v1417_v30 = vpop.permute.xlu0 %1416 }
0x12bd   :  { %v1419_v38 = vadd.f32 %v1417_v30, %v1409_v28 }
0x12bf   :  { %1788 = vtanh.f32 %v1419_v38 }
0x12c5   :  { %v1789_v39 = vpop.eup %1788 }
0x12c6   :  { %1422 = vrot.lane.b32.xlu2 %v1789_v39, %s1804_s0 }
0x1320   :  { %v1423_v40 = vpop.permute.xlu2 %1422 }
0x1321   :  { %v1425_v44 = vmul.f32 %v1423_v40, %v1408_v14  ;;  %v1699_v14 = vld [vmem:[#allocation2] ss:$0 sm:$0xff] }
0x1323   :  { %1427 = vrot.lane.b32.xlu0 %v1425_v44, %s1803_s21 }
0x1327   :  { %v1361_v41 = vpop.permute.xlu1 %1360 }
0x1328   :  { %v1363_v12 = vmul.f32 %v1361_v41, %v1346_v33 }
0x132a   :  { %1431 = vrot.lane.b32.xlu1 %v1363_v12, %s1804_s0 }
0x1395   :  { %v2551_v20 = vpop.permute.xlu0 %1427 }
0x139c   :  { %v1432_v56 = vpop.permute.xlu1 %1431 }
0x139d   :  { %v1434_v31 = vsel %vm419_vm0, %v2551_v20, %v1432_v56 }
0x139e   :  { %1686 = vmatmul.msk.f32.vlgmr.msra.gmra.mxu3 %vm499_vm8, %v1434_v31 }
0x1421   :  { %v1455_v29 = vpop.f32.mrf.mxu3 }
0x1422   :  { %v1456_v43 = vadd.f32 %v2534_v48, %v1455_v29 }
0x1424   :  { %v1687_v42 = vmul.f32 -1.442695, %v1456_v43 }
0x1426   :  { %1790 = vpow2.f32 %v1687_v42 }
0x142c   :  { %v1791_v15 = vpop.eup %1790 }
0x142d   :  { %v1461_v57 = vadd.f32 1.0, %v1791_v15 }
0x142f   :  { %1792 = vrcp.f32 %v1461_v57  ;;  %v1473_v46 = vand.u32 2147483648, %v1461_v57  ;;  %v1471_v10 = vand.u32 2147483647, %v1461_v57  ;;  %vm1467_vm14 = vweird.f32 %v1461_v57 }
0x1431   :  { %v1474_v50 = vor.u32 1.1754944e-38, %v1473_v46  ;;  %vm1472_vm1 = vcmp.eq.f32.partialorder %v1471_v10, 8.507059e+37 }
0x1435   :  { %v1793_v9 = vpop.eup %1792 }
0x1436   :  { %v1463_v47 = vmul.f32 %v1793_v9, %v1461_v57  ;;  %vm1468_vm13 = vweird.f32 %v1793_v9 }
0x1437   :  { %vm1469_vm15 = vmor %vm1467_vm14, %vm1468_vm13 }
0x1438   :  { %v1464_v60 = vsub.f32 1.0, %v1463_v47 }
0x143a   :  { %v1465_v37 = vmul.f32 %v1793_v9, %v1464_v60 }
0x143c   :  { %v1466_v49 = vadd.f32 %v1793_v9, %v1465_v37 }
0x143e   :  { %v1470_v51 = vsel %vm1469_vm15, %v1793_v9, %v1466_v49 }
0x143f   :  { %v1475_v61 = vsel %vm1472_vm1, %v1474_v50, %v1470_v51 }
0x1440   :  { %v1477_v48 = vmul.f32 2.0, %v1475_v61 }
0x1442   :  { %v1688_v5 = vadd.f32 -1.0, %v1477_v48 }
0x1444   :  { %v1479_v0 = vsel %vm2223_vm7, %v1688_v5, %v1475_v61  ;;  %vm1564_vm7 = vcmask 785408  }
0x1445   :  { %1482 = vrot.lane.b32.xlu2 %v1479_v0, %s1804_s0  ;;  %v1480_v18 = vmul.f32 %v1479_v0, %v1357_v26 }
0x149f   :  { %v1483_v1 = vpop.permute.xlu2 %1482 }
0x14a0   :  { %v1485_v27 = vmul.f32 %v1483_v1, %v1479_v0 }
0x14a2   :  { %1487 = vrot.lane.b32.xlu0 %v1485_v27, %s1803_s21 }
0x1514   :  { %v1488_v53 = vpop.permute.xlu0 %1487 }
0x1515   :  { %v1490_v21 = vadd.f32 %v1488_v53, %v1480_v18 }
0x1517   :  { %1794 = vtanh.f32 %v1490_v21 }
0x151d   :  { %v1795_v54 = vpop.eup %1794 }
0x151e   :  { %1493 = vrot.lane.b32.xlu1 %v1795_v54, %s1804_s0 }
0x1526   :  { %1555 = vrot.lane.b32.xlu1 %v1419_v38, %s1803_s21 }
0x1590   :  { %v1494_v8 = vpop.permute.xlu1 %1493 }
0x1591   :  { %v1496_v55 = vmul.f32 %v1494_v8, %v1479_v0 }
0x1593   :  { %1551 = vrot.lane.b32.xlu0 %v1496_v55, %s1804_s0  ;;  %1506 = vrot.lane.b32.xlu2 %v1496_v55, %s1803_s21 }
0x1598   :  { %v1556_v59 = vpop.permute.xlu1 %1555 }
0x159b   :  { %1559 = vrot.lane.b32.xlu2 %v1490_v21, %s1804_s0 }
0x15ed   :  { %v1507_v2 = vpop.permute.xlu2 %1506 }
0x15ee   :  { %1689 = vmatmul.msk.f32.vlgmr.msra.gmra.mxu1 %vm419_vm0, %v1507_v2 }
0x15f5   :  { %v1560_v7 = vpop.permute.xlu2 %1559 }
0x1605   :  { %v1552_v6 = vpop.permute.xlu0 %1551 }
0x1606   :  { %v1562_v52 = vsel %vm419_vm0, %v2551_v20, %v1552_v6 }
0x1607   :  { %v1563_v11 = vsel %vm499_vm8, %v1562_v52, %v1556_v59 }
0x1608   :  { %v1565_v13 = vsel %vm1564_vm7, %v1563_v11, %v1560_v7 }
0x1609   :  { %1566 = vst [vmem:[%s2600_s10] sm:$0xff] %v1565_v13 }
0x166b   :  { %v1527_v16 = vpop.f32.mrf.mxu1 }
0x166c   :  { %v1528_v17 = vadd.f32 %v1699_v14, %v1527_v16 }
0x166e   :  { %v1690_v19 = vmul.f32 -1.442695, %v1528_v17 }
0x1670   :  { %1796 = vpow2.f32 %v1690_v19 }
0x1676   :  { %v1797_v22 = vpop.eup %1796 }
0x1677   :  { %v1533_v23 = vadd.f32 1.0, %v1797_v22 }
0x1679   :  { %1798 = vrcp.f32 %v1533_v23  ;;  %v1545_v35 = vand.u32 2147483648, %v1533_v23  ;;  %v1543_v25 = vand.u32 2147483647, %v1533_v23  ;;  %vm1539_vm8 = vweird.f32 %v1533_v23 }
0x167b   :  { %v1546_v26 = vor.u32 1.1754944e-38, %v1545_v35  ;;  %vm1544_vm4 = vcmp.eq.f32.partialorder %v1543_v25, 8.507059e+37 }
0x167f   :  { %v1799_v33 = vpop.eup %1798 }
0x1680   :  { %v1535_v34 = vmul.f32 %v1799_v33, %v1533_v23  ;;  %vm1540_vm0 = vweird.f32 %v1799_v33 }
0x1681   :  { %vm1541_vm2 = vmor %vm1539_vm8, %vm1540_vm0 }
0x1682   :  { %v1536_v3 = vsub.f32 1.0, %v1535_v34 }
0x1684   :  { %v1537_v24 = vmul.f32 %v1799_v33, %v1536_v3 }
0x1686   :  { %v1538_v45 = vadd.f32 %v1799_v33, %v1537_v24 }
0x1688   :  { %v1542_v36 = vsel %vm1541_vm2, %v1799_v33, %v1538_v45 }
0x1689   :  { %v1547_v28 = vsel %vm1544_vm4, %v1546_v26, %v1542_v36 }
0x168a   :  { %1550 = vst.msk [vmem:[%s2601_s9] sm:$0xff] %vm1549_vm3, %v1547_v28 }

</bundles_post_ra>
